<compile_context>
chip_gen: v5e
topology: v5e:2x2
jax: 0.10.0
libtpu: 0.0.40
codegen_flags: <defaults>
</compile_context>

<pallas_src>
import jax
import jax.numpy as jnp
from jax.experimental import pallas as pl
from jax.experimental.pallas import tpu as pltpu

C_IN = 256
KH = KW = 8
C_HID = 128
N_DISC = 11
N_HEAD = N_DISC + 2              # fused head columns: 11 disc | 1 mu | 1 var
K_FULL = C_IN * KH * KW          # 16384
TK = 8192                        # K tile -> 2 grid steps; bf16 w1 block = 2 MiB
BN_EPS = 1e-5
LEAKY_SLOPE = 0.1


def _qhead_kernel(x_ref, w1_ref, b1_ref, wh_ref, bh_ref, out_ref, acc_ref):
    k = pl.program_id(0)

    # Zero the f32 accumulator on the first K-tile.
    @pl.when(k == 0)
    def _():
        acc_ref[...] = jnp.zeros_like(acc_ref)

    # conv1 (8x8, no bias) as a tiled bf16 matmul on the MXU, f32 accumulation.
    # x arrives as f32 and is cast here (VPU, hidden under the w1 DMA); the
    # eval-mode BN scale (gamma * rsqrt(var + eps)) is pre-folded into w1.
    acc_ref[...] += jnp.dot(x_ref[...].astype(jnp.bfloat16), w1_ref[...],
                            preferred_element_type=jnp.float32)

    # Epilogue on the last K-tile: folded BN bias + leaky_relu + fused heads.
    @pl.when(k == pl.num_programs(0) - 1)
    def _():
        h = acc_ref[...] + b1_ref[...]                        # (N, 128) f32
        h = jnp.where(h >= 0.0, h, LEAKY_SLOPE * h)           # leaky_relu(0.1)
        # Fused disc|mu|var heads: one (N,128)x(128,13) matmul + one store.
        out_ref[...] = (jnp.dot(h, wh_ref[...],
                                preferred_element_type=jnp.float32)
                        + bh_ref[...])


def prepare_params(params):
    """One-time parameter prep: fold BN (eval mode), cast w1 to bf16, fuse heads.

    Done once (outside the per-call jit) so the 8 MiB f32 w1 is not re-read /
    re-written on every forward call.
    """
    (w1, gamma, beta, r_mean, r_var, wd, bd, wm, bm, wv, bv) = params
    scale = gamma * jax.lax.rsqrt(r_var + BN_EPS)             # (1, 128)
    w1_folded = (w1 * scale).astype(jnp.bfloat16)             # (K, 128) bf16
    b1 = beta - r_mean * scale                                # (1, 128) f32
    wh = jnp.concatenate([wd, wm, wv], axis=1)                # (128, 13) f32
    bh = jnp.concatenate([bd, bm, bv], axis=1)                # (1, 13)  f32
    return w1_folded, b1, wh, bh


@jax.jit
def qhead_forward(x, prepared):
    """x: (N, 256, 8, 8) float32 NCHW.  Returns (disc_logits, mu, var)."""
    w1p, b1, wh, bh = prepared
    N = x.shape[0]
    x_flat = x.reshape(N, K_FULL)      # free reshape; bf16 cast happens in-kernel
    n_k = K_FULL // TK

    fused = pl.pallas_call(
        _qhead_kernel,
        out_shape=jax.ShapeDtypeStruct((N, N_HEAD), jnp.float32),
        grid_spec=pltpu.PrefetchScalarGridSpec(
            num_scalar_prefetch=0,
            grid=(n_k,),
            in_specs=[
                pl.BlockSpec((N, TK), lambda k: (0, k)),          # x (f32)
                pl.BlockSpec((TK, C_HID), lambda k: (k, 0)),      # folded w1 (bf16)
                pl.BlockSpec((1, C_HID), lambda k: (0, 0)),       # folded BN bias
                pl.BlockSpec((C_HID, N_HEAD), lambda k: (0, 0)),  # fused head W
                pl.BlockSpec((1, N_HEAD), lambda k: (0, 0)),      # fused head bias
            ],
            out_specs=pl.BlockSpec((N, N_HEAD), lambda k: (0, 0)),
            scratch_shapes=[pltpu.VMEM((N, C_HID), jnp.float32)],
        ),
        compiler_params=pltpu.CompilerParams(
            dimension_semantics=("arbitrary",),   # K is a reduction axis
            vmem_limit_bytes=32 * 1024 * 1024),
    )(x_flat, w1p, b1, wh, bh)

    disc = fused[:, :N_DISC]
    mu = fused[:, N_DISC:N_DISC + 1]
    # exp of the single var column on the sliced output (N elems; negligible).
    var = jnp.exp(fused[:, N_DISC + 1:])

    # torch .squeeze() semantics (N > 1): (N,11,1,1)->(N,11), (N,1,1,1)->(N,)
    return jnp.squeeze(disc), jnp.squeeze(mu), jnp.squeeze(var)


def make_params():
    """Deterministic synthetic parameters matching QHead.__init__ shapes."""
    keys = jax.random.split(jax.random.PRNGKey(42), 8)
    # conv1: (128, 256, 8, 8) no bias  -> flattened/transposed to (K, 128)
    w1_4d = 0.02 * jax.random.normal(keys[0], (C_HID, C_IN, KH, KW), jnp.float32)
    w1 = w1_4d.reshape(C_HID, K_FULL).T                       # (K, 128)
    # BatchNorm2d(128) eval-mode parameters (kept 2-D for VMEM friendliness)
    gamma = (1.0 + 0.1 * jax.random.normal(keys[1], (1, C_HID), jnp.float32))
    beta = 0.1 * jax.random.normal(keys[2], (1, C_HID), jnp.float32)
    r_mean = 0.1 * jax.random.normal(keys[3], (1, C_HID), jnp.float32)
    r_var = 1.0 + 0.1 * jax.nn.softplus(
        jax.random.normal(keys[4], (1, C_HID), jnp.float32))
    # conv_disc: (11, 128, 1, 1) + bias
    wd = 0.05 * jax.random.normal(keys[5], (C_HID, N_DISC), jnp.float32)
    bd = 0.01 * jnp.arange(N_DISC, dtype=jnp.float32).reshape(1, N_DISC)
    # conv_mu: (1, 128, 1, 1) + bias
    wm = 0.05 * jax.random.normal(keys[6], (C_HID, 1), jnp.float32)
    bm = jnp.full((1, 1), 0.02, jnp.float32)
    # conv_var: (1, 128, 1, 1) + bias
    wv = 0.05 * jax.random.normal(keys[7], (C_HID, 1), jnp.float32)
    bv = jnp.full((1, 1), -0.01, jnp.float32)
    return (w1, gamma, beta, r_mean, r_var, wd, bd, wm, bm, wv, bv)


def reference_forward(x, params):
    """Pure-JAX f32 reference (same math, no Pallas) for a sanity check."""
    (w1, gamma, beta, r_mean, r_var, wd, bd, wm, bm, wv, bv) = params
    N = x.shape[0]
    h = x.reshape(N, K_FULL) @ w1
    h = (h - r_mean) * jax.lax.rsqrt(r_var + BN_EPS) * gamma + beta
    h = jnp.where(h >= 0.0, h, LEAKY_SLOPE * h)
    disc = h @ wd + bd
    mu = h @ wm + bm
    var = jnp.exp(h @ wv + bv)
    return jnp.squeeze(disc), jnp.squeeze(mu), jnp.squeeze(var)


if __name__ == "__main__":
    N = 2
    key = jax.random.PRNGKey(0)
    x = jax.random.normal(key, (N, C_IN, KH, KW), jnp.float32)  # NCHW input

    params = make_params()
    prepared = prepare_params(params)           # fold BN + fuse heads (once)

    disc, mu, var = qhead_forward(x, prepared)
    jax.block_until_ready((disc, mu, var))

    # Sanity check against the pure-JAX f32 reference (bf16 matmul tolerance).
    disc_r, mu_r, var_r = reference_forward(x, params)
    assert disc.shape == (N, N_DISC) and mu.shape == (N,) and var.shape == (N,)
    assert jnp.allclose(disc, disc_r, rtol=2e-2, atol=2e-2)
    assert jnp.allclose(mu, mu_r, rtol=2e-2, atol=2e-2)
    assert jnp.allclose(var, var_r, rtol=2e-2, atol=2e-2)

    print("KERNEL_OK")
</pallas_src>

<mosaic_0001>
module attributes {stable_mosaic.version = 11 : i64} {
  func.func @_qhead_kernel(%arg0: i32, %arg1: memref<2x8192xf32, #tpu.memory_space<vmem>>, %arg2: memref<8192x128xbf16, #tpu.memory_space<vmem>>, %arg3: memref<1x128xf32, #tpu.memory_space<vmem>>, %arg4: memref<128x13xf32, #tpu.memory_space<vmem>>, %arg5: memref<1x13xf32, #tpu.memory_space<vmem>>, %arg6: memref<2x13xf32, #tpu.memory_space<vmem>>, %arg7: memref<2x128xf32, #tpu.memory_space<vmem>>) attributes {dimension_semantics = [#tpu.dimension_semantics<arbitrary>], iteration_bounds = array<i64: 2>, scalar_prefetch = 0 : i64, scratch_operands = 1 : i64, tpu.core_type = #tpu.core_type<tc>, window_params = [{transform_indices = @transform_0, window_bounds = array<i64: 2, 8192>}, {transform_indices = @transform_1, window_bounds = array<i64: 8192, 128>}, {pipeline_mode = #tpu.pipeline_mode<synchronous>, transform_indices = @transform_2, window_bounds = array<i64: 1, 128>}, {pipeline_mode = #tpu.pipeline_mode<synchronous>, transform_indices = @transform_3, window_bounds = array<i64: 128, 13>}, {pipeline_mode = #tpu.pipeline_mode<synchronous>, transform_indices = @transform_4, window_bounds = array<i64: 1, 13>}, {pipeline_mode = #tpu.pipeline_mode<synchronous>, transform_indices = @transform_5, window_bounds = array<i64: 2, 13>}]} {
    %c0_i32 = arith.constant 0 : i32
    %0 = arith.cmpi eq, %arg0, %c0_i32 : i32
    %1 = arith.extui %0 : i1 to i32
    %c0_i32_0 = arith.constant 0 : i32
    %2 = arith.cmpi ne, %1, %c0_i32_0 : i32
    scf.if %2 {
      %cst_9 = arith.constant 0.000000e+00 : f32
      %13 = vector.broadcast %cst_9 : f32 to vector<2x128xf32>
      %c0_10 = arith.constant 0 : index
      %c0_11 = arith.constant 0 : index
      %14 = vector.load %arg7[%c0_10, %c0_11] : memref<2x128xf32, #tpu.memory_space<vmem>>, vector<2x128xf32>
      tpu.vector_store %arg7[%c0_10, %c0_11], %13 {strides = array<i32>} : memref<2x128xf32, #tpu.memory_space<vmem>>, vector<2x128xf32>,
    } else {
    }
    %c0 = arith.constant 0 : index
    %c0_1 = arith.constant 0 : index
    %3 = vector.load %arg7[%c0, %c0_1] : memref<2x128xf32, #tpu.memory_space<vmem>>, vector<2x128xf32>
    %c0_2 = arith.constant 0 : index
    %c0_3 = arith.constant 0 : index
    %4 = vector.load %arg1[%c0_2, %c0_3] : memref<2x8192xf32, #tpu.memory_space<vmem>>, vector<2x8192xf32>
    %5 = arith.truncf %4 : vector<2x8192xf32> to vector<2x8192xbf16>
    %c0_4 = arith.constant 0 : index
    %c0_5 = arith.constant 0 : index
    %6 = vector.load %arg2[%c0_4, %c0_5] : memref<8192x128xbf16, #tpu.memory_space<vmem>>, vector<8192x128xbf16>
    %cst = arith.constant dense<0.000000e+00> : vector<2x128xf32>
    %7 = tpu.matmul %5, %6, %cst {dimension_numbers = #tpu.dot_dimension_numbers<[1], [0], [0], [1], [0, 0, 1, 1], [], []>} : vector<2x8192xbf16>, vector<8192x128xbf16>, vector<2x128xf32> -> vector<2x128xf32>
    %8 = arith.addf %3, %7 : vector<2x128xf32>
    %c0_6 = arith.constant 0 : index
    %c0_7 = arith.constant 0 : index
    %9 = vector.load %arg7[%c0_6, %c0_7] : memref<2x128xf32, #tpu.memory_space<vmem>>, vector<2x128xf32>
    tpu.vector_store %arg7[%c0_6, %c0_7], %8 {strides = array<i32>} : memref<2x128xf32, #tpu.memory_space<vmem>>, vector<2x128xf32>,
    %c1_i32 = arith.constant 1 : i32
    %10 = arith.cmpi eq, %arg0, %c1_i32 : i32
    %11 = arith.extui %10 : i1 to i32
    %c0_i32_8 = arith.constant 0 : i32
    %12 = arith.cmpi ne, %11, %c0_i32_8 : i32
    scf.if %12 {
      %c0_9 = arith.constant 0 : index
      %c0_10 = arith.constant 0 : index
      %13 = vector.load %arg7[%c0_9, %c0_10] : memref<2x128xf32, #tpu.memory_space<vmem>>, vector<2x128xf32>
      %c0_11 = arith.constant 0 : index
      %c0_12 = arith.constant 0 : index
      %14 = vector.load %arg3[%c0_11, %c0_12] : memref<1x128xf32, #tpu.memory_space<vmem>>, vector<1x128xf32>
      %15 = vector.broadcast %14 : vector<1x128xf32> to vector<2x128xf32>
      %16 = arith.addf %13, %15 : vector<2x128xf32>
      %cst_13 = arith.constant 0.000000e+00 : f32
      %17 = vector.broadcast %cst_13 : f32 to vector<2x128xf32>
      %18 = arith.cmpf oge, %16, %17 : vector<2x128xf32>
      %cst_14 = arith.constant 1.000000e-01 : f32
      %19 = vector.broadcast %cst_14 : f32 to vector<2x128xf32>
      %20 = arith.mulf %19, %16 : vector<2x128xf32>
      %21 = arith.select %18, %16, %20 : vector<2x128xi1>, vector<2x128xf32>
      %c0_15 = arith.constant 0 : index
      %c0_16 = arith.constant 0 : index
      %22 = vector.load %arg4[%c0_15, %c0_16] : memref<128x13xf32, #tpu.memory_space<vmem>>, vector<128x13xf32>
      %cst_17 = arith.constant dense<0.000000e+00> : vector<2x13xf32>
      %23 = tpu.matmul %21, %22, %cst_17 {dimension_numbers = #tpu.dot_dimension_numbers<[1], [0], [0], [1], [0, 0, 1, 1], [], []>} : vector<2x128xf32>, vector<128x13xf32>, vector<2x13xf32> -> vector<2x13xf32>
      %c0_18 = arith.constant 0 : index
      %c0_19 = arith.constant 0 : index
      %24 = vector.load %arg5[%c0_18, %c0_19] : memref<1x13xf32, #tpu.memory_space<vmem>>, vector<1x13xf32>
      %25 = vector.broadcast %24 : vector<1x13xf32> to vector<2x13xf32>
      %26 = arith.addf %23, %25 : vector<2x13xf32>
      %c0_20 = arith.constant 0 : index
      %c0_21 = arith.constant 0 : index
      %27 = vector.load %arg6[%c0_20, %c0_21] : memref<2x13xf32, #tpu.memory_space<vmem>>, vector<2x13xf32>
      tpu.vector_store %arg6[%c0_20, %c0_21], %26 {strides = array<i32>} : memref<2x13xf32, #tpu.memory_space<vmem>>, vector<2x13xf32>,
    } else {
    }
    return
  }
  func.func @transform_0(%arg0: i32) -> (i32, i32) {
    %c0_i32 = arith.constant 0 : i32
    %c0_i32_0 = arith.constant 0 : i32
    return %c0_i32, %arg0 : i32, i32
  }
  func.func @transform_1(%arg0: i32) -> (i32, i32) {
    %c0_i32 = arith.constant 0 : i32
    %c0_i32_0 = arith.constant 0 : i32
    return %arg0, %c0_i32 : i32, i32
  }
  func.func @transform_2(%arg0: i32) -> (i32, i32) {
    %c0_i32 = arith.constant 0 : i32
    %c0_i32_0 = arith.constant 0 : i32
    %c0_i32_1 = arith.constant 0 : i32
    return %c0_i32, %c0_i32_0 : i32, i32
  }
  func.func @transform_3(%arg0: i32) -> (i32, i32) {
    %c0_i32 = arith.constant 0 : i32
    %c0_i32_0 = arith.constant 0 : i32
    %c0_i32_1 = arith.constant 0 : i32
    return %c0_i32, %c0_i32_0 : i32, i32
  }
  func.func @transform_4(%arg0: i32) -> (i32, i32) {
    %c0_i32 = arith.constant 0 : i32
    %c0_i32_0 = arith.constant 0 : i32
    %c0_i32_1 = arith.constant 0 : i32
    return %c0_i32, %c0_i32_0 : i32, i32
  }
  func.func @transform_5(%arg0: i32) -> (i32, i32) {
    %c0_i32 = arith.constant 0 : i32
    %c0_i32_0 = arith.constant 0 : i32
    %c0_i32_1 = arith.constant 0 : i32
    return %c0_i32, %c0_i32_0 : i32, i32
  }
}

</mosaic_0001>

<bundles_post_ra>
// kernel: qhead_forward.1
= control target key start
LH: loop header
LB: loop body
LE: loop exit
PB: predicated region body
PF: predicated region fallthrough
CT: control target
= control target key end

     0   :  { %s8128_s18 = smov 0   ;;  %s8818_s0 = inlined_call_operand.vmem [shape: f32[2,16384], index: 0, kind: input, shape index: {}]   ;;  %s8819_s1 = inlined_call_operand.vmem [shape: bf16[16384,128], index: 1, kind: input, shape index: {}]   ;;  %s8820_s2 = inlined_call_operand.vmem [shape: f32[1,128], index: 2, kind: input, shape index: {}]   ;;  %s8821_s3 = inlined_call_operand.vmem [shape: f32[128,13], index: 3, kind: input, shape index: {}]   ;;  %s8822_s4 = inlined_call_operand.vmem [shape: f32[1,13], index: 4, kind: input, shape index: {}]   ;;  %s8823_s5 = inlined_call_operand.vmem [shape: f32[2,13], index: 5, kind: output, shape index: {}]  }
   0x1 LB: > { %s8134_s19 = sadd.s32 4294967295, %s8095_s18   ;;  %p5509_p0 = scmp.ge.s32.totalorder %s8095_s18, 1  ;;  %s8095_s18 = sphi %s8128_s18, %s15_s18  }
   0x2   : > { %p194_p1 = scmp.lt.s32.totalorder %s8095_s18, 3 }
   0x4   : > { %p195_p2 = pnand %p5509_p0, %p194_p1 }
   0x5   : > { %s5510_s20 = sshll.u32 (!%p195_p2), %s8134_s19, 6  ;;  %s5512_s21 = sshll.u32 (!%p195_p2), %s8134_s19, 10 }
   0x6   : > { %198 = sbr.rel (%p195_p2) target bundleno = 837 (0x345), region = 40  ;;  %p223_p3 = scmp.lt.s32.totalorder (!%p195_p2), %s5510_s20, 127 }
   0x7   : > { %p229_p4 = scmp.lt.s32.totalorder (!%p195_p2), %s5512_s21, 2047  ;;  %p5514_p5 = scmp.ne.s32.totalorder (!%p195_p2), %s8134_s19, 0 }
   0xb   : > { %s8825_s20 = smov (!%p223_p3, %s5510_s20), 127  ;;  %s8827_s21 = smov (!%p229_p4, %s5512_s21), 2047 }
   0xc   : > { %s5511_s22 = sshll.u32 %s8825_s20, 1  ;;  %s5513_s26 = sshll.u32 %s8827_s21, 2 }
   0xd   : > { %s8143_s25 = scalar_lea.vmem %s8818_s0, %s5511_s22  ;;  %s8148_s29 = scalar_lea.vmem %s8819_s1, %s5513_s26 }
   0xe   : > { %237 = sbr.rel (%p5514_p5) target bundleno = 21 (0x15), region = 44 }
  0x13   : > { %v8097_v0 = vmov 0.0  }
  0x14   : > { %238 = vst [vmem:[#allocation2] sm:$0x3] %v8097_v0 }
  0x15 PF: > { %v7573_v1 = vld [vmem:[%s8148_s29 + $0x38] sm:$0xff]  ;;  %v7572_v5 = vld [vmem:[%s8148_s29 + $0x30] sm:$0xff]  ;;  %v7571_v9 = vld [vmem:[%s8148_s29 + $0x28] sm:$0xff]  ;;  %p7563_p6 = scmp.ne.s32.totalorder %s8134_s19, 1 }
  0x16   : > { %v7581_v2 = vld [vmem:[%s8148_s29 + $0x78] sm:$0xff]  ;;  %4577 = vmatpush.bf16.msra.mxu0 %v7573_v1  ;;  %v7580_v6 = vld [vmem:[%s8148_s29 + $0x70] sm:$0xff]  ;;  %v7579_v10 = vld [vmem:[%s8148_s29 + $0x68] sm:$0xff] }
  0x17   : > { %v7589_v3 = vld [vmem:[%s8148_s29 + $0xb8] sm:$0xff]  ;;  %4590 = vmatpush.bf16.msra.mxu1 %v7581_v2  ;;  %v7588_v7 = vld [vmem:[%s8148_s29 + $0xb0] sm:$0xff]  ;;  %v7587_v11 = vld [vmem:[%s8148_s29 + $0xa8] sm:$0xff] }
  0x18   : > { %v7597_v4 = vld [vmem:[%s8148_s29 + $0xf8] sm:$0xff]  ;;  %4603 = vmatpush.bf16.msra.mxu2 %v7589_v3  ;;  %v7596_v8 = vld [vmem:[%s8148_s29 + $0xf0] sm:$0xff]  ;;  %v7595_v12 = vld [vmem:[%s8148_s29 + $0xe8] sm:$0xff] }
  0x19   : > { %4616 = vmatpush.bf16.msra.mxu3 %v7597_v4  ;;  %v7570_v13 = vld [vmem:[%s8148_s29 + $0x20] sm:$0xff]  ;;  %v7569_v17 = vld [vmem:[%s8148_s29 + $0x18] sm:$0xff]  ;;  %v7568_v22 = vld [vmem:[%s8148_s29 + $0x10] sm:$0xff] }
  0x1a   : > { %4578 = vmatpush.bf16.msra.mxu0 %v7572_v5  ;;  %v7578_v14 = vld [vmem:[%s8148_s29 + $0x60] sm:$0xff]  ;;  %v7577_v18 = vld [vmem:[%s8148_s29 + $0x58] sm:$0xff]  ;;  %v7576_v23 = vld [vmem:[%s8148_s29 + $0x50] sm:$0xff] }
  0x1b   : > { %4591 = vmatpush.bf16.msra.mxu1 %v7580_v6  ;;  %v7586_v15 = vld [vmem:[%s8148_s29 + $0xa0] sm:$0xff]  ;;  %v7585_v19 = vld [vmem:[%s8148_s29 + $0x98] sm:$0xff]  ;;  %v7584_v24 = vld [vmem:[%s8148_s29 + $0x90] sm:$0xff] }
  0x1c   : > { %4604 = vmatpush.bf16.msra.mxu2 %v7588_v7  ;;  %v7594_v16 = vld [vmem:[%s8148_s29 + $0xe0] sm:$0xff]  ;;  %v7593_v20 = vld [vmem:[%s8148_s29 + $0xd8] sm:$0xff]  ;;  %v7592_v25 = vld [vmem:[%s8148_s29 + $0xd0] sm:$0xff] }
  0x1d   : > { %4617 = vmatpush.bf16.msra.mxu3 %v7596_v8  ;;  %v240_v21 = vld [vmem:[%s8143_s25] sm:$0xff]  ;;  %v7567_v26 = vld [vmem:[%s8148_s29 + $0x8] sm:$0xff]  ;;  %v242_v32 = vld [vmem:[%s8143_s25 + $0x10] sm:$0xff] }
  0x1e   : > { %4579 = vmatpush.bf16.msra.mxu0 %v7571_v9  ;;  %272 = vst [vmem:[#allocation1] ss:$4 sm:$0xff] %v240_v21  ;;  %v7575_v27 = vld [vmem:[%s8148_s29 + $0x48] sm:$0xff]  ;;  %v7566_v30 = vld [vmem:[%s8148_s29] sm:$0xff]  ;;  %v7605_v39 = vld [vmem:[%s8148_s29 + $0x138] sm:$0xff] }
  0x1f   : > { %4592 = vmatpush.bf16.msra.mxu1 %v7579_v10  ;;  %v7583_v28 = vld [vmem:[%s8148_s29 + $0x88] sm:$0xff]  ;;  %v7574_v31 = vld [vmem:[%s8148_s29 + $0x40] sm:$0xff]  ;;  %v7613_v40 = vld [vmem:[%s8148_s29 + $0x178] sm:$0xff] }
  0x20   : > { %4605 = vmatpush.bf16.msra.mxu2 %v7587_v11  ;;  %v7591_v29 = vld [vmem:[%s8148_s29 + $0xc8] sm:$0xff]  ;;  %v7582_v37 = vld [vmem:[%s8148_s29 + $0x80] sm:$0xff]  ;;  %v7621_v41 = vld [vmem:[%s8148_s29 + $0x1b8] sm:$0xff] }
  0x21   : > { %4618 = vmatpush.bf16.msra.mxu3 %v7595_v12  ;;  %v7590_v38 = vld [vmem:[%s8148_s29 + $0xc0] sm:$0xff]  ;;  %v7629_v42 = vld [vmem:[%s8148_s29 + $0x1f8] sm:$0xff]  ;;  %v241_v43 = vld [vmem:[%s8143_s25 + $0x8] sm:$0xff] }
  0x22   : > { %4580 = vmatpush.bf16.msra.mxu0 %v7570_v13  ;;  %274 = vst [vmem:[#allocation1 + $0x20] ss:$4 sm:$0xff] %v241_v43  ;;  %v7604_v48 = vld [vmem:[%s8148_s29 + $0x130] sm:$0xff]  ;;  %v7603_v52 = vld [vmem:[%s8148_s29 + $0x128] sm:$0xff]  ;;  %v243_v59 = vld [vmem:[%s8143_s25 + $0x18] sm:$0xff] }
  0x23   : > { %4593 = vmatpush.bf16.msra.mxu1 %v7578_v14  ;;  %v7612_v49 = vld [vmem:[%s8148_s29 + $0x170] sm:$0xff]  ;;  %v7611_v53 = vld [vmem:[%s8148_s29 + $0x168] sm:$0xff]  ;;  %v7602_v61 = vld [vmem:[%s8148_s29 + $0x120] sm:$0xff] }
  0x24   : > { %4606 = vmatpush.bf16.msra.mxu2 %v7586_v15  ;;  %v7620_v50 = vld [vmem:[%s8148_s29 + $0x1b0] sm:$0xff]  ;;  %v7619_v54 = vld [vmem:[%s8148_s29 + $0x1a8] sm:$0xff]  ;;  %v7610_v62 = vld [vmem:[%s8148_s29 + $0x160] sm:$0xff] }
  0x25   : > { %4619 = vmatpush.bf16.msra.mxu3 %v7594_v16  ;;  %v277_v33 = vld.sshfl [vmem:[#allocation1 + $0x10] sm:$0xff pattern:$0x73625140]  ;;  %v275_v34 = vld.sshfl [vmem:[#allocation1] sm:$0xff pattern:$0x73625140] }
  0x26   : > { %4581 = vmatpush.bf16.msra.mxu0 %v7569_v17  ;;  %v278_v35 = vld.sshfl [vmem:[#allocation1 + $0x18] sm:$0xff pattern:$0x73625140]  ;;  %v276_v36 = vld.sshfl [vmem:[#allocation1 + $0x8] sm:$0xff pattern:$0x73625140]  ;;  %v419_v44 = vpack.c.bf16 %v277_v33, %v277_v33  ;;  %v417_v45 = vpack.c.bf16 %v275_v34, %v275_v34 }
  0x27   : > { %4594 = vmatpush.bf16.msra.mxu1 %v7577_v18  ;;  %283 = vst [vmem:[#allocation1] ss:$4 sm:$0xff] %v242_v32  ;;  %v420_v46 = vpack.c.bf16 %v278_v35, %v278_v35  ;;  %v418_v47 = vpack.c.bf16 %v276_v36, %v276_v36  ;;  %v7628_v51 = vld [vmem:[%s8148_s29 + $0x1f0] sm:$0xff]  ;;  %v7627_v55 = vld [vmem:[%s8148_s29 + $0x1e8] sm:$0xff]  ;;  %v7618_v63 = vld [vmem:[%s8148_s29 + $0x1a0] sm:$0xff] }
  0x28   : > { %4607 = vmatpush.bf16.msra.mxu2 %v7585_v19  ;;  %v7626_v0 = vld [vmem:[%s8148_s29 + $0x1e0] sm:$0xff]  ;;  %v7601_v1 = vld [vmem:[%s8148_s29 + $0x118] sm:$0xff]  ;;  %v7600_v5 = vld [vmem:[%s8148_s29 + $0x110] sm:$0xff] }
  0x29   : > { %4620 = vmatpush.bf16.msra.mxu3 %v7593_v20  ;;  %v8198_v56 = vld.sshfl [vmem:[#allocation1 + $0x30] sm:$0xff pattern:$0x73625140]  ;;  %v8200_v57 = vld.sshfl [vmem:[#allocation1 + $0x20] sm:$0xff pattern:$0x73625140] }
  0x2a   : > { %4582 = vmatpush.bf16.msra.mxu0 %v7568_v22  ;;  %v8202_v58 = vld.sshfl [vmem:[#allocation1 + $0x38] sm:$0xff pattern:$0x73625140]  ;;  %v8205_v60 = vld.sshfl [vmem:[#allocation1 + $0x28] sm:$0xff pattern:$0x73625140]  ;;  %v423_v22 = vpack.c.bf16 %v8198_v56, %v8198_v56 }
  0x2b   : > { %4595 = vmatpush.bf16.msra.mxu1 %v7576_v23  ;;  %284 = vst [vmem:[#allocation1 + $0x20] ss:$4 sm:$0xff] %v243_v59  ;;  %v7609_v2 = vld [vmem:[%s8148_s29 + $0x158] sm:$0xff]  ;;  %v7608_v6 = vld [vmem:[%s8148_s29 + $0x150] sm:$0xff]  ;;  %v7599_v9 = vld [vmem:[%s8148_s29 + $0x108] sm:$0xff]  ;;  %v421_v23 = vpack.c.bf16 %v8200_v57, %v8200_v57 }
  0x2c   : > { %4608 = vmatpush.bf16.msra.mxu2 %v7584_v24  ;;  %v7617_v3 = vld [vmem:[%s8148_s29 + $0x198] sm:$0xff]  ;;  %v7616_v7 = vld [vmem:[%s8148_s29 + $0x190] sm:$0xff]  ;;  %v7607_v10 = vld [vmem:[%s8148_s29 + $0x148] sm:$0xff] }
  0x2d   : > { %4621 = vmatpush.bf16.msra.mxu3 %v7592_v25  ;;  %v7625_v4 = vld [vmem:[%s8148_s29 + $0x1d8] sm:$0xff]  ;;  %v7624_v8 = vld [vmem:[%s8148_s29 + $0x1d0] sm:$0xff]  ;;  %v7615_v11 = vld [vmem:[%s8148_s29 + $0x188] sm:$0xff] }
  0x2e   : > { %4583 = vmatpush.bf16.msra.mxu0 %v7567_v26  ;;  %v7623_v12 = vld [vmem:[%s8148_s29 + $0x1c8] sm:$0xff]  ;;  %v7598_v13 = vld [vmem:[%s8148_s29 + $0x100] sm:$0xff]  ;;  %v7637_v17 = vld [vmem:[%s8148_s29 + $0x238] sm:$0xff]  ;;  %v424_v26 = vpack.c.bf16 %v8202_v58, %v8202_v58 }
  0x2f   : > { %4596 = vmatpush.bf16.msra.mxu1 %v7575_v27  ;;  %v7606_v14 = vld [vmem:[%s8148_s29 + $0x140] sm:$0xff]  ;;  %v7645_v18 = vld [vmem:[%s8148_s29 + $0x278] sm:$0xff]  ;;  %v7636_v21 = vld [vmem:[%s8148_s29 + $0x230] sm:$0xff]  ;;  %v422_v27 = vpack.c.bf16 %v8205_v60, %v8205_v60 }
  0x30   : > { %4609 = vmatpush.bf16.msra.mxu2 %v7583_v28  ;;  %v7614_v15 = vld [vmem:[%s8148_s29 + $0x180] sm:$0xff]  ;;  %v7653_v19 = vld [vmem:[%s8148_s29 + $0x2b8] sm:$0xff]  ;;  %v7644_v24 = vld [vmem:[%s8148_s29 + $0x270] sm:$0xff] }
  0x31   : > { %4622 = vmatpush.bf16.msra.mxu3 %v7591_v29  ;;  %v7622_v16 = vld [vmem:[%s8148_s29 + $0x1c0] sm:$0xff]  ;;  %v7661_v20 = vld [vmem:[%s8148_s29 + $0x2f8] sm:$0xff]  ;;  %v7652_v25 = vld [vmem:[%s8148_s29 + $0x2b0] sm:$0xff] }
  0x32   : > { %4584 = vmatpush.bf16.msra.mxu0 %v7566_v30  ;;  %v8242_v28 = vld.sshfl [vmem:[#allocation1] sm:$0xff pattern:$0x73625140]  ;;  %v8244_v29 = vld.sshfl [vmem:[#allocation1 + $0x10] sm:$0xff pattern:$0x73625140] }
  0x33   : > { %4597 = vmatpush.bf16.msra.mxu1 %v7574_v31  ;;  %v8246_v30 = vld.sshfl [vmem:[#allocation1 + $0x8] sm:$0xff pattern:$0x73625140]  ;;  %v7660_v31 = vld [vmem:[%s8148_s29 + $0x2f0] sm:$0xff]  ;;  %v244_v32 = vld [vmem:[%s8143_s25 + $0x20] sm:$0xff] }
  0x34   : > { %4610 = vmatpush.bf16.msra.mxu2 %v7582_v37  ;;  %v8250_v33 = vld.sshfl [vmem:[#allocation1 + $0x18] sm:$0xff pattern:$0x73625140]  ;;  %v7635_v34 = vld [vmem:[%s8148_s29 + $0x228] sm:$0xff]  ;;  %v7646_v56 = vld [vmem:[%s8148_s29 + $0x280] sm:$0xff] }
  0x35   : > { %4623 = vmatpush.bf16.msra.mxu3 %v7590_v38  ;;  %4585 = vmatmul.bf16.vlgmr.msra.gmra.mxu0 %v417_v45  ;;  %293 = vst [vmem:[#allocation1] ss:$4 sm:$0xff] %v244_v32  ;;  %v7643_v35 = vld [vmem:[%s8148_s29 + $0x268] sm:$0xff]  ;;  %v7634_v38 = vld [vmem:[%s8148_s29 + $0x220] sm:$0xff]  ;;  %v7641_v43 = vld [vmem:[%s8148_s29 + $0x258] sm:$0xff] }
  0x36   : > { %4629 = vmatpush.bf16.msrb.mxu0 %v7605_v39  ;;  %4598 = vmatmul.bf16.vlgmr.msra.gmra.mxu1 %v418_v47  ;;  %v7651_v36 = vld [vmem:[%s8148_s29 + $0x2a8] sm:$0xff]  ;;  %v7642_v39 = vld [vmem:[%s8148_s29 + $0x260] sm:$0xff]  ;;  %v7657_v45 = vld [vmem:[%s8148_s29 + $0x2d8] sm:$0xff] }
  0x37   : > { %4642 = vmatpush.bf16.msrb.mxu1 %v7613_v40  ;;  %4611 = vmatmul.bf16.vlgmr.msra.gmra.mxu2 %v419_v44  ;;  %v7659_v37 = vld [vmem:[%s8148_s29 + $0x2e8] sm:$0xff]  ;;  %v7650_v40 = vld [vmem:[%s8148_s29 + $0x2a0] sm:$0xff]  ;;  %v7649_v44 = vld [vmem:[%s8148_s29 + $0x298] sm:$0xff] }
  0x38   : > { %4655 = vmatpush.bf16.msrb.mxu2 %v7621_v41  ;;  %4624 = vmatmul.bf16.vlgmr.msra.gmra.mxu3 %v420_v46  ;;  %v7658_v41 = vld [vmem:[%s8148_s29 + $0x2e0] sm:$0xff]  ;;  %v7632_v46 = vld [vmem:[%s8148_s29 + $0x210] sm:$0xff]  ;;  %v7669_v58 = vld [vmem:[%s8148_s29 + $0x338] sm:$0xff] }
  0x39   : > { %4668 = vmatpush.bf16.msrb.mxu3 %v7629_v42  ;;  %v7633_v42 = vld [vmem:[%s8148_s29 + $0x218] sm:$0xff]  ;;  %v7640_v47 = vld [vmem:[%s8148_s29 + $0x250] sm:$0xff]  ;;  %v7654_v57 = vld [vmem:[%s8148_s29 + $0x2c0] sm:$0xff] }
  0x3a   : > { %4630 = vmatpush.bf16.msrb.mxu0 %v7604_v48  ;;  %v7648_v48 = vld [vmem:[%s8148_s29 + $0x290] sm:$0xff]  ;;  %v7677_v59 = vld [vmem:[%s8148_s29 + $0x378] sm:$0xff]  ;;  %v7670_v32 = vld [vmem:[%s8148_s29 + $0x340] sm:$0xff] }
  0x3b   : > { %4643 = vmatpush.bf16.msrb.mxu1 %v7612_v49  ;;  %v7656_v49 = vld [vmem:[%s8148_s29 + $0x2d0] sm:$0xff]  ;;  %v7685_v60 = vld [vmem:[%s8148_s29 + $0x3b8] sm:$0xff] }
  0x3c   : > { %4656 = vmatpush.bf16.msrb.mxu2 %v7620_v50  ;;  %v7631_v50 = vld [vmem:[%s8148_s29 + $0x208] sm:$0xff] }
  0x3d   : > { %4669 = vmatpush.bf16.msrb.mxu3 %v7628_v51  ;;  %v7639_v51 = vld [vmem:[%s8148_s29 + $0x248] sm:$0xff] }
  0x3e   : > { %4631 = vmatpush.bf16.msrb.mxu0 %v7603_v52  ;;  %v7647_v52 = vld [vmem:[%s8148_s29 + $0x288] sm:$0xff] }
  0x3f   : > { %4644 = vmatpush.bf16.msrb.mxu1 %v7611_v53  ;;  %v7655_v53 = vld [vmem:[%s8148_s29 + $0x2c8] sm:$0xff] }
  0x40   : > { %4657 = vmatpush.bf16.msrb.mxu2 %v7619_v54  ;;  %v7630_v54 = vld [vmem:[%s8148_s29 + $0x200] sm:$0xff] }
  0x41   : > { %4670 = vmatpush.bf16.msrb.mxu3 %v7627_v55  ;;  %v7638_v55 = vld [vmem:[%s8148_s29 + $0x240] sm:$0xff] }
  0x42   : > { %4632 = vmatpush.bf16.msrb.mxu0 %v7602_v61  ;;  %v7693_v61 = vld [vmem:[%s8148_s29 + $0x3f8] sm:$0xff] }
  0x43   : > { %4645 = vmatpush.bf16.msrb.mxu1 %v7610_v62  ;;  %v425_v62 = vpack.c.bf16 %v8242_v28, %v8242_v28  ;;  %v7671_v28 = vld [vmem:[%s8148_s29 + $0x348] sm:$0xff] }
  0x44   : > { %4658 = vmatpush.bf16.msrb.mxu2 %v7618_v63  ;;  %v427_v63 = vpack.c.bf16 %v8244_v29, %v8244_v29  ;;  %v7679_v29 = vld [vmem:[%s8148_s29 + $0x388] sm:$0xff] }
  0x45   : > { %4671 = vmatpush.bf16.msrb.mxu3 %v7626_v0  ;;  %v7668_v0 = vld [vmem:[%s8148_s29 + $0x330] sm:$0xff] }
  0x46   : > { %4633 = vmatpush.bf16.msrb.mxu0 %v7601_v1  ;;  %v426_v1 = vpack.c.bf16 %v8246_v30, %v8246_v30  ;;  %v7687_v30 = vld [vmem:[%s8148_s29 + $0x3c8] sm:$0xff] }
  0x47   : > { %4646 = vmatpush.bf16.msrb.mxu1 %v7609_v2  ;;  %v428_v2 = vpack.c.bf16 %v8250_v33, %v8250_v33  ;;  %v7678_v33 = vld [vmem:[%s8148_s29 + $0x380] sm:$0xff] }
  0x48   : > { %4659 = vmatpush.bf16.msrb.mxu2 %v7617_v3  ;;  %v7676_v3 = vld [vmem:[%s8148_s29 + $0x370] sm:$0xff] }
  0x49   : > { %4672 = vmatpush.bf16.msrb.mxu3 %v7625_v4  ;;  %v7684_v4 = vld [vmem:[%s8148_s29 + $0x3b0] sm:$0xff] }
  0x4a   : > { %4634 = vmatpush.bf16.msrb.mxu0 %v7600_v5  ;;  %v8291_v5 = vld.sshfl [vmem:[#allocation1 + $0x20] sm:$0xff pattern:$0x73625140] }
  0x4b   : > { %4647 = vmatpush.bf16.msrb.mxu1 %v7608_v6  ;;  %v8293_v6 = vld.sshfl [vmem:[#allocation1 + $0x30] sm:$0xff pattern:$0x73625140] }
  0x4c   : > { %4660 = vmatpush.bf16.msrb.mxu2 %v7616_v7  ;;  %v8295_v7 = vld.sshfl [vmem:[#allocation1 + $0x28] sm:$0xff pattern:$0x73625140] }
  0x4d   : > { %4673 = vmatpush.bf16.msrb.mxu3 %v7624_v8  ;;  %v7692_v8 = vld [vmem:[%s8148_s29 + $0x3f0] sm:$0xff] }
  0x4e   : > { %4635 = vmatpush.bf16.msrb.mxu0 %v7599_v9  ;;  %v245_v9 = vld [vmem:[%s8143_s25 + $0x28] sm:$0xff] }
  0x4f   : > { %4648 = vmatpush.bf16.msrb.mxu1 %v7607_v10  ;;  %v8299_v10 = vld.sshfl [vmem:[#allocation1 + $0x38] sm:$0xff pattern:$0x73625140] }
  0x50   : > { %4661 = vmatpush.bf16.msrb.mxu2 %v7615_v11  ;;  %294 = vst [vmem:[#allocation1 + $0x20] ss:$4 sm:$0xff] %v245_v9  ;;  %v7667_v11 = vld [vmem:[%s8148_s29 + $0x328] sm:$0xff]  ;;  %v295_v9 = vld.sshfl [vmem:[#allocation1] sm:$0xff pattern:$0x73625140] }
  0x51   : > { %4674 = vmatpush.bf16.msrb.mxu3 %v7623_v12  ;;  %v7675_v12 = vld [vmem:[%s8148_s29 + $0x368] sm:$0xff] }
  0x52   : > { %4636 = vmatpush.bf16.msrb.mxu0 %v7598_v13  ;;  %v7683_v13 = vld [vmem:[%s8148_s29 + $0x3a8] sm:$0xff] }
  0x53   : > { %4649 = vmatpush.bf16.msrb.mxu1 %v7606_v14  ;;  %v7691_v14 = vld [vmem:[%s8148_s29 + $0x3e8] sm:$0xff] }
  0x54   : > { %4662 = vmatpush.bf16.msrb.mxu2 %v7614_v15  ;;  %v7666_v15 = vld [vmem:[%s8148_s29 + $0x320] sm:$0xff] }
  0x55   : > { %4675 = vmatpush.bf16.msrb.mxu3 %v7622_v16  ;;  %4637 = vmatmul.bf16.vlgmr.msrb.gmra.mxu0 %v421_v23  ;;  %v7674_v16 = vld [vmem:[%s8148_s29 + $0x360] sm:$0xff]  ;;  %v7664_v23 = vld [vmem:[%s8148_s29 + $0x310] sm:$0xff] }
  0x56   : > { %4681 = vmatpush.bf16.msra.mxu0 %v7637_v17  ;;  %4650 = vmatmul.bf16.vlgmr.msrb.gmra.mxu1 %v422_v27  ;;  %v7682_v17 = vld [vmem:[%s8148_s29 + $0x3a0] sm:$0xff]  ;;  %v7663_v27 = vld [vmem:[%s8148_s29 + $0x308] sm:$0xff] }
  0x57   : > { %4694 = vmatpush.bf16.msra.mxu1 %v7645_v18  ;;  %4663 = vmatmul.bf16.vlgmr.msrb.gmra.mxu2 %v423_v22  ;;  %v7690_v18 = vld [vmem:[%s8148_s29 + $0x3e0] sm:$0xff]  ;;  %v7689_v22 = vld [vmem:[%s8148_s29 + $0x3d8] sm:$0xff] }
  0x58   : > { %4707 = vmatpush.bf16.msra.mxu2 %v7653_v19  ;;  %4676 = vmatmul.bf16.vlgmr.msrb.gmra.mxu3 %v424_v26  ;;  %v7665_v19 = vld [vmem:[%s8148_s29 + $0x318] sm:$0xff]  ;;  %v7688_v26 = vld [vmem:[%s8148_s29 + $0x3d0] sm:$0xff] }
  0x59   : > { %4720 = vmatpush.bf16.msra.mxu3 %v7661_v20  ;;  %v7673_v20 = vld [vmem:[%s8148_s29 + $0x358] sm:$0xff] }
  0x5a   : > { %4682 = vmatpush.bf16.msra.mxu0 %v7636_v21  ;;  %v7681_v21 = vld [vmem:[%s8148_s29 + $0x398] sm:$0xff] }
  0x5b   : > { %4695 = vmatpush.bf16.msra.mxu1 %v7644_v24  ;;  %v7672_v24 = vld [vmem:[%s8148_s29 + $0x350] sm:$0xff] }
  0x5c   : > { %4708 = vmatpush.bf16.msra.mxu2 %v7652_v25  ;;  %v7680_v25 = vld [vmem:[%s8148_s29 + $0x390] sm:$0xff] }
  0x5d   : > { %4721 = vmatpush.bf16.msra.mxu3 %v7660_v31  ;;  %v7662_v31 = vld [vmem:[%s8148_s29 + $0x300] sm:$0xff] }
  0x5e   : > { %4683 = vmatpush.bf16.msra.mxu0 %v7635_v34  ;;  %v7686_v34 = vld [vmem:[%s8148_s29 + $0x3c0] sm:$0xff] }
  0x5f   : > { %4696 = vmatpush.bf16.msra.mxu1 %v7643_v35  ;;  %v7701_v35 = vld [vmem:[%s8148_s29 + $0x438] sm:$0xff] }
  0x60   : > { %4709 = vmatpush.bf16.msra.mxu2 %v7651_v36  ;;  %v7709_v36 = vld [vmem:[%s8148_s29 + $0x478] sm:$0xff] }
  0x61   : > { %4722 = vmatpush.bf16.msra.mxu3 %v7659_v37  ;;  %v7717_v37 = vld [vmem:[%s8148_s29 + $0x4b8] sm:$0xff] }
  0x62   : > { %4684 = vmatpush.bf16.msra.mxu0 %v7634_v38  ;;  %v7725_v38 = vld [vmem:[%s8148_s29 + $0x4f8] sm:$0xff] }
  0x63   : > { %4697 = vmatpush.bf16.msra.mxu1 %v7642_v39  ;;  %v429_v39 = vpack.c.bf16 %v8291_v5, %v8291_v5  ;;  %v7710_v5 = vld [vmem:[%s8148_s29 + $0x480] sm:$0xff] }
  0x64   : > { %4710 = vmatpush.bf16.msra.mxu2 %v7650_v40  ;;  %v431_v40 = vpack.c.bf16 %v8293_v6, %v8293_v6  ;;  %v7718_v6 = vld [vmem:[%s8148_s29 + $0x4c0] sm:$0xff] }
  0x65   : > { %4723 = vmatpush.bf16.msra.mxu3 %v7658_v41  ;;  %v430_v41 = vpack.c.bf16 %v8295_v7, %v8295_v7  ;;  %v7733_v7 = vld [vmem:[%s8148_s29 + $0x538] sm:$0xff] }
  0x66   : > { %4685 = vmatpush.bf16.msra.mxu0 %v7633_v42  ;;  %v432_v42 = vpack.c.bf16 %v8299_v10, %v8299_v10  ;;  %v297_v10 = vld.sshfl [vmem:[#allocation1 + $0x10] sm:$0xff pattern:$0x73625140] }
  0x67   : > { %4698 = vmatpush.bf16.msra.mxu1 %v7641_v43  ;;  %v7700_v43 = vld [vmem:[%s8148_s29 + $0x430] sm:$0xff] }
  0x68   : > { %4711 = vmatpush.bf16.msra.mxu2 %v7649_v44  ;;  %v7708_v44 = vld [vmem:[%s8148_s29 + $0x470] sm:$0xff] }
  0x69   : > { %4724 = vmatpush.bf16.msra.mxu3 %v7657_v45  ;;  %v7716_v45 = vld [vmem:[%s8148_s29 + $0x4b0] sm:$0xff] }
  0x6a   : > { %4686 = vmatpush.bf16.msra.mxu0 %v7632_v46  ;;  %v7724_v46 = vld [vmem:[%s8148_s29 + $0x4f0] sm:$0xff] }
  0x6b   : > { %4699 = vmatpush.bf16.msra.mxu1 %v7640_v47  ;;  %v7699_v47 = vld [vmem:[%s8148_s29 + $0x428] sm:$0xff] }
  0x6c   : > { %4712 = vmatpush.bf16.msra.mxu2 %v7648_v48  ;;  %v7707_v48 = vld [vmem:[%s8148_s29 + $0x468] sm:$0xff] }
  0x6d   : > { %4725 = vmatpush.bf16.msra.mxu3 %v7656_v49  ;;  %v7715_v49 = vld [vmem:[%s8148_s29 + $0x4a8] sm:$0xff] }
  0x6e   : > { %4687 = vmatpush.bf16.msra.mxu0 %v7631_v50  ;;  %v7723_v50 = vld [vmem:[%s8148_s29 + $0x4e8] sm:$0xff] }
  0x6f   : > { %4700 = vmatpush.bf16.msra.mxu1 %v7639_v51  ;;  %v7698_v51 = vld [vmem:[%s8148_s29 + $0x420] sm:$0xff] }
  0x70   : > { %4713 = vmatpush.bf16.msra.mxu2 %v7647_v52  ;;  %v7706_v52 = vld [vmem:[%s8148_s29 + $0x460] sm:$0xff] }
  0x71   : > { %4726 = vmatpush.bf16.msra.mxu3 %v7655_v53  ;;  %v7714_v53 = vld [vmem:[%s8148_s29 + $0x4a0] sm:$0xff] }
  0x72   : > { %4688 = vmatpush.bf16.msra.mxu0 %v7630_v54  ;;  %v7722_v54 = vld [vmem:[%s8148_s29 + $0x4e0] sm:$0xff] }
  0x73   : > { %4701 = vmatpush.bf16.msra.mxu1 %v7638_v55  ;;  %v7697_v55 = vld [vmem:[%s8148_s29 + $0x418] sm:$0xff] }
  0x74   : > { %4714 = vmatpush.bf16.msra.mxu2 %v7646_v56  ;;  %v7705_v56 = vld [vmem:[%s8148_s29 + $0x458] sm:$0xff] }
  0x75   : > { %4727 = vmatpush.bf16.msra.mxu3 %v7654_v57  ;;  %4689 = vmatmul.bf16.vlgmr.msra.gmra.mxu0 %v425_v62  ;;  %v7713_v57 = vld [vmem:[%s8148_s29 + $0x498] sm:$0xff]  ;;  %v7720_v62 = vld [vmem:[%s8148_s29 + $0x4d0] sm:$0xff] }
  0x76   : > { %4733 = vmatpush.bf16.msrb.mxu0 %v7669_v58  ;;  %4702 = vmatmul.bf16.vlgmr.msra.gmra.mxu1 %v426_v1  ;;  %v7721_v58 = vld [vmem:[%s8148_s29 + $0x4d8] sm:$0xff]  ;;  %v7711_v1 = vld [vmem:[%s8148_s29 + $0x488] sm:$0xff] }
  0x77   : > { %4746 = vmatpush.bf16.msrb.mxu1 %v7677_v59  ;;  %4715 = vmatmul.bf16.vlgmr.msra.gmra.mxu2 %v427_v63  ;;  %v7696_v59 = vld [vmem:[%s8148_s29 + $0x410] sm:$0xff]  ;;  %v7695_v63 = vld [vmem:[%s8148_s29 + $0x408] sm:$0xff] }
  0x78   : > { %4759 = vmatpush.bf16.msrb.mxu2 %v7685_v60  ;;  %4728 = vmatmul.bf16.vlgmr.msra.gmra.mxu3 %v428_v2  ;;  %v7704_v60 = vld [vmem:[%s8148_s29 + $0x450] sm:$0xff]  ;;  %v7719_v2 = vld [vmem:[%s8148_s29 + $0x4c8] sm:$0xff] }
  0x79   : > { %4772 = vmatpush.bf16.msrb.mxu3 %v7693_v61  ;;  %v7712_v61 = vld [vmem:[%s8148_s29 + $0x490] sm:$0xff] }
  0x7a   : > { %4734 = vmatpush.bf16.msrb.mxu0 %v7668_v0  ;;  %v7703_v0 = vld [vmem:[%s8148_s29 + $0x448] sm:$0xff] }
  0x7b   : > { %4747 = vmatpush.bf16.msrb.mxu1 %v7676_v3  ;;  %v7694_v3 = vld [vmem:[%s8148_s29 + $0x400] sm:$0xff] }
  0x7c   : > { %4760 = vmatpush.bf16.msrb.mxu2 %v7684_v4  ;;  %v7702_v4 = vld [vmem:[%s8148_s29 + $0x440] sm:$0xff] }
  0x7d   : > { %4773 = vmatpush.bf16.msrb.mxu3 %v7692_v8  ;;  %v7741_v8 = vld [vmem:[%s8148_s29 + $0x578] sm:$0xff] }
  0x7e   : > { %4735 = vmatpush.bf16.msrb.mxu0 %v7667_v11  ;;  %v296_v11 = vld.sshfl [vmem:[#allocation1 + $0x8] sm:$0xff pattern:$0x73625140] }
  0x7f   : > { %4748 = vmatpush.bf16.msrb.mxu1 %v7675_v12  ;;  %v298_v12 = vld.sshfl [vmem:[#allocation1 + $0x18] sm:$0xff pattern:$0x73625140] }
  0x80   : > { %4761 = vmatpush.bf16.msrb.mxu2 %v7683_v13  ;;  %v7749_v13 = vld [vmem:[%s8148_s29 + $0x5b8] sm:$0xff] }
  0x81   : > { %4774 = vmatpush.bf16.msrb.mxu3 %v7691_v14  ;;  %v7757_v14 = vld [vmem:[%s8148_s29 + $0x5f8] sm:$0xff] }
  0x82   : > { %4736 = vmatpush.bf16.msrb.mxu0 %v7666_v15  ;;  %v433_v15 = vpack.c.bf16 %v295_v9, %v295_v9  ;;  %v7780_v9 = vld [vmem:[%s8148_s29 + $0x6b0] sm:$0xff] }
  0x83   : > { %4749 = vmatpush.bf16.msrb.mxu1 %v7674_v16  ;;  %v435_v16 = vpack.c.bf16 %v297_v10, %v297_v10  ;;  %v7788_v10 = vld [vmem:[%s8148_s29 + $0x6f0] sm:$0xff] }
  0x84   : > { %4762 = vmatpush.bf16.msrb.mxu2 %v7682_v17  ;;  %v434_v17 = vpack.c.bf16 %v296_v11, %v296_v11  ;;  %v7763_v11 = vld [vmem:[%s8148_s29 + $0x628] sm:$0xff] }
  0x85   : > { %4775 = vmatpush.bf16.msrb.mxu3 %v7690_v18  ;;  %v436_v18 = vpack.c.bf16 %v298_v12, %v298_v12  ;;  %v7771_v12 = vld [vmem:[%s8148_s29 + $0x668] sm:$0xff] }
  0x86   : > { %4737 = vmatpush.bf16.msrb.mxu0 %v7665_v19  ;;  %v7732_v19 = vld [vmem:[%s8148_s29 + $0x530] sm:$0xff] }
  0x87   : > { %4750 = vmatpush.bf16.msrb.mxu1 %v7673_v20  ;;  %v7740_v20 = vld [vmem:[%s8148_s29 + $0x570] sm:$0xff] }
  0x88   : > { %4763 = vmatpush.bf16.msrb.mxu2 %v7681_v21  ;;  %v7748_v21 = vld [vmem:[%s8148_s29 + $0x5b0] sm:$0xff] }
  0x89   : > { %4776 = vmatpush.bf16.msrb.mxu3 %v7689_v22  ;;  %v7756_v22 = vld [vmem:[%s8148_s29 + $0x5f0] sm:$0xff] }
  0x8a   : > { %4738 = vmatpush.bf16.msrb.mxu0 %v7664_v23  ;;  %v7731_v23 = vld [vmem:[%s8148_s29 + $0x528] sm:$0xff] }
  0x8b   : > { %4751 = vmatpush.bf16.msrb.mxu1 %v7672_v24  ;;  %v7739_v24 = vld [vmem:[%s8148_s29 + $0x568] sm:$0xff] }
  0x8c   : > { %4764 = vmatpush.bf16.msrb.mxu2 %v7680_v25  ;;  %v7747_v25 = vld [vmem:[%s8148_s29 + $0x5a8] sm:$0xff] }
  0x8d   : > { %4777 = vmatpush.bf16.msrb.mxu3 %v7688_v26  ;;  %v7755_v26 = vld [vmem:[%s8148_s29 + $0x5e8] sm:$0xff] }
  0x8e   : > { %4739 = vmatpush.bf16.msrb.mxu0 %v7663_v27 }
  0x8f   : > { %4752 = vmatpush.bf16.msrb.mxu1 %v7671_v28  ;;  %v7730_v28 = vld [vmem:[%s8148_s29 + $0x520] sm:$0xff] }
  0x90   : > { %4765 = vmatpush.bf16.msrb.mxu2 %v7679_v29  ;;  %v7738_v29 = vld [vmem:[%s8148_s29 + $0x560] sm:$0xff] }
  0x91   : > { %4778 = vmatpush.bf16.msrb.mxu3 %v7687_v30 }
  0x92   : > { %4740 = vmatpush.bf16.msrb.mxu0 %v7662_v31  ;;  %v7746_v31 = vld [vmem:[%s8148_s29 + $0x5a0] sm:$0xff] }
  0x93   : > { %4753 = vmatpush.bf16.msrb.mxu1 %v7670_v32  ;;  %v7754_v32 = vld [vmem:[%s8148_s29 + $0x5e0] sm:$0xff] }
  0x94   : > { %4766 = vmatpush.bf16.msrb.mxu2 %v7678_v33 }
  0x95   : > { %4779 = vmatpush.bf16.msrb.mxu3 %v7686_v34  ;;  %4741 = vmatmul.bf16.vlgmr.msrb.gmra.mxu0 %v429_v39  ;;  %v7729_v34 = vld [vmem:[%s8148_s29 + $0x518] sm:$0xff] }
  0x96   : > { %4785 = vmatpush.bf16.msra.mxu0 %v7701_v35  ;;  %4754 = vmatmul.bf16.vlgmr.msrb.gmra.mxu1 %v430_v41  ;;  %v7737_v35 = vld [vmem:[%s8148_s29 + $0x558] sm:$0xff] }
  0x97   : > { %4798 = vmatpush.bf16.msra.mxu1 %v7709_v36  ;;  %4767 = vmatmul.bf16.vlgmr.msrb.gmra.mxu2 %v431_v40  ;;  %v7745_v36 = vld [vmem:[%s8148_s29 + $0x598] sm:$0xff] }
  0x98   : > { %4811 = vmatpush.bf16.msra.mxu2 %v7717_v37  ;;  %4780 = vmatmul.bf16.vlgmr.msrb.gmra.mxu3 %v432_v42  ;;  %v7753_v37 = vld [vmem:[%s8148_s29 + $0x5d8] sm:$0xff]  ;;  %v7728_v42 = vld [vmem:[%s8148_s29 + $0x510] sm:$0xff] }
  0x99   : > { %4824 = vmatpush.bf16.msra.mxu3 %v7725_v38 }
  0x9a   : > { %4786 = vmatpush.bf16.msra.mxu0 %v7700_v43  ;;  %v7736_v43 = vld [vmem:[%s8148_s29 + $0x550] sm:$0xff] }
  0x9b   : > { %4799 = vmatpush.bf16.msra.mxu1 %v7708_v44 }
  0x9c   : > { %4812 = vmatpush.bf16.msra.mxu2 %v7716_v45 }
  0x9d   : > { %4825 = vmatpush.bf16.msra.mxu3 %v7724_v46  ;;  %v7744_v46 = vld [vmem:[%s8148_s29 + $0x590] sm:$0xff] }
  0x9e   : > { %4787 = vmatpush.bf16.msra.mxu0 %v7699_v47  ;;  %v7752_v47 = vld [vmem:[%s8148_s29 + $0x5d0] sm:$0xff] }
  0x9f   : > { %4800 = vmatpush.bf16.msra.mxu1 %v7707_v48  ;;  %v7727_v48 = vld [vmem:[%s8148_s29 + $0x508] sm:$0xff] }
  0xa0   : > { %4813 = vmatpush.bf16.msra.mxu2 %v7715_v49  ;;  %v7735_v49 = vld [vmem:[%s8148_s29 + $0x548] sm:$0xff] }
  0xa1   : > { %4826 = vmatpush.bf16.msra.mxu3 %v7723_v50  ;;  %v246_v50 = vld [vmem:[%s8143_s25 + $0x30] sm:$0xff] }
  0xa2   : > { %4788 = vmatpush.bf16.msra.mxu0 %v7698_v51  ;;  %v7743_v51 = vld [vmem:[%s8148_s29 + $0x588] sm:$0xff]  ;;  %303 = vst [vmem:[#allocation1] ss:$4 sm:$0xff] %v246_v50 }
  0xa3   : > { %4801 = vmatpush.bf16.msra.mxu1 %v7706_v52  ;;  %v7751_v52 = vld [vmem:[%s8148_s29 + $0x5c8] sm:$0xff] }
  0xa4   : > { %4814 = vmatpush.bf16.msra.mxu2 %v7714_v53 }
  0xa5   : > { %4827 = vmatpush.bf16.msra.mxu3 %v7722_v54 }
  0xa6   : > { %4789 = vmatpush.bf16.msra.mxu0 %v7697_v55  ;;  %v7726_v55 = vld [vmem:[%s8148_s29 + $0x500] sm:$0xff] }
  0xa7   : > { %4802 = vmatpush.bf16.msra.mxu1 %v7705_v56  ;;  %v7734_v56 = vld [vmem:[%s8148_s29 + $0x540] sm:$0xff] }
  0xa8   : > { %4815 = vmatpush.bf16.msra.mxu2 %v7713_v57  ;;  %v7742_v57 = vld [vmem:[%s8148_s29 + $0x580] sm:$0xff] }
  0xa9   : > { %4828 = vmatpush.bf16.msra.mxu3 %v7721_v58  ;;  %v7750_v58 = vld [vmem:[%s8148_s29 + $0x5c0] sm:$0xff] }
  0xaa   : > { %4790 = vmatpush.bf16.msra.mxu0 %v7696_v59  ;;  %v7765_v59 = vld [vmem:[%s8148_s29 + $0x638] sm:$0xff]  ;;  %v305_v50 = vld.sshfl [vmem:[#allocation1] sm:$0xff pattern:$0x73625140] }
  0xab   : > { %4803 = vmatpush.bf16.msra.mxu1 %v7704_v60  ;;  %v7773_v60 = vld [vmem:[%s8148_s29 + $0x678] sm:$0xff] }
  0xac   : > { %4816 = vmatpush.bf16.msra.mxu2 %v7712_v61  ;;  %v299_v61 = vld.sshfl [vmem:[#allocation1 + $0x20] sm:$0xff pattern:$0x73625140] }
  0xad   : > { %4829 = vmatpush.bf16.msra.mxu3 %v7720_v62  ;;  %v301_v62 = vld.sshfl [vmem:[#allocation1 + $0x30] sm:$0xff pattern:$0x73625140] }
  0xae   : > { %4791 = vmatpush.bf16.msra.mxu0 %v7695_v63  ;;  %v300_v63 = vld.sshfl [vmem:[#allocation1 + $0x28] sm:$0xff pattern:$0x73625140] }
  0xaf   : > { %4804 = vmatpush.bf16.msra.mxu1 %v7703_v0  ;;  %v302_v0 = vld.sshfl [vmem:[#allocation1 + $0x38] sm:$0xff pattern:$0x73625140] }
  0xb0   : > { %4817 = vmatpush.bf16.msra.mxu2 %v7711_v1  ;;  %v7781_v1 = vld [vmem:[%s8148_s29 + $0x6b8] sm:$0xff] }
  0xb1   : > { %4830 = vmatpush.bf16.msra.mxu3 %v7719_v2  ;;  %v7789_v2 = vld [vmem:[%s8148_s29 + $0x6f8] sm:$0xff] }
  0xb2   : > { %4792 = vmatpush.bf16.msra.mxu0 %v7694_v3  ;;  %v4586_v27 = vpop.f32.mrf.mxu0  ;;  %v437_v3 = vpack.c.bf16 %v299_v61, %v299_v61  ;;  %v7804_v61 = vld [vmem:[%s8148_s29 + $0x770] sm:$0xff] }
  0xb3   : > { %4805 = vmatpush.bf16.msra.mxu1 %v7702_v4  ;;  %v4599_v30 = vpop.f32.mrf.mxu1  ;;  %v439_v4 = vpack.c.bf16 %v301_v62, %v301_v62  ;;  %v7812_v62 = vld [vmem:[%s8148_s29 + $0x7b0] sm:$0xff] }
  0xb4   : > { %4818 = vmatpush.bf16.msra.mxu2 %v7710_v5  ;;  %v4600_v33 = vadd.f32 %v4599_v30, %v4586_v27  ;;  %v438_v5 = vpack.c.bf16 %v300_v63, %v300_v63  ;;  %v7820_v63 = vld [vmem:[%s8148_s29 + $0x7f0] sm:$0xff] }
  0xb5   : > { %4831 = vmatpush.bf16.msra.mxu3 %v7718_v6  ;;  %4793 = vmatmul.bf16.vlgmr.msra.gmra.mxu0 %v433_v15  ;;  %v440_v6 = vpack.c.bf16 %v302_v0, %v302_v0  ;;  %v7795_v0 = vld [vmem:[%s8148_s29 + $0x728] sm:$0xff] }
  0xb6   : > { %4837 = vmatpush.bf16.msrb.mxu0 %v7733_v7  ;;  %4806 = vmatmul.bf16.vlgmr.msra.gmra.mxu1 %v434_v17  ;;  %v7764_v7 = vld [vmem:[%s8148_s29 + $0x630] sm:$0xff]  ;;  %v7770_v17 = vld [vmem:[%s8148_s29 + $0x660] sm:$0xff] }
  0xb7   : > { %4850 = vmatpush.bf16.msrb.mxu1 %v7741_v8  ;;  %4819 = vmatmul.bf16.vlgmr.msra.gmra.mxu2 %v435_v16  ;;  %v7772_v8 = vld [vmem:[%s8148_s29 + $0x670] sm:$0xff]  ;;  %v7762_v16 = vld [vmem:[%s8148_s29 + $0x620] sm:$0xff] }
  0xb8   : > { %4863 = vmatpush.bf16.msrb.mxu2 %v7749_v13  ;;  %4832 = vmatmul.bf16.vlgmr.msra.gmra.mxu3 %v436_v18  ;;  %v7779_v13 = vld [vmem:[%s8148_s29 + $0x6a8] sm:$0xff] }
  0xb9   : > { %4876 = vmatpush.bf16.msrb.mxu3 %v7757_v14  ;;  %v7787_v14 = vld [vmem:[%s8148_s29 + $0x6e8] sm:$0xff] }
  0xba   : > { %4838 = vmatpush.bf16.msrb.mxu0 %v7732_v19  ;;  %v4612_v38 = vpop.f32.mrf.mxu2  ;;  %v4588_v41 = vpop.f32.mrf.mxu0 }
  0xbb   : > { %4851 = vmatpush.bf16.msrb.mxu1 %v7740_v20  ;;  %v4613_v39 = vadd.f32 %v4612_v38, %v4600_v33  ;;  %v4625_v40 = vpop.f32.mrf.mxu3  ;;  %v4601_v45 = vpop.f32.mrf.mxu1  ;;  %v7778_v20 = vld [vmem:[%s8148_s29 + $0x6a0] sm:$0xff]  ;;  %v7767_v38 = vld [vmem:[%s8148_s29 + $0x648] sm:$0xff] }
  0xbc   : > { %4864 = vmatpush.bf16.msrb.mxu2 %v7748_v21  ;;  %v7786_v21 = vld [vmem:[%s8148_s29 + $0x6e0] sm:$0xff]  ;;  %v7783_v41 = vld [vmem:[%s8148_s29 + $0x6c8] sm:$0xff] }
  0xbd   : > { %4877 = vmatpush.bf16.msrb.mxu3 %v7756_v22  ;;  %v8387_v44 = vadd.f32 %v4625_v40, %v4613_v39  ;;  %v247_v39 = vld [vmem:[%s8143_s25 + $0x38] sm:$0xff]  ;;  %v7775_v40 = vld [vmem:[%s8148_s29 + $0x688] sm:$0xff]  ;;  %v7766_v45 = vld [vmem:[%s8148_s29 + $0x640] sm:$0xff] }
  0xbe   : > { %4839 = vmatpush.bf16.msrb.mxu0 %v7731_v23  ;;  %v7761_v23 = vld [vmem:[%s8148_s29 + $0x618] sm:$0xff]  ;;  %304 = vst [vmem:[#allocation1 + $0x20] ss:$4 sm:$0xff] %v247_v39 }
  0xbf   : > { %4852 = vmatpush.bf16.msrb.mxu1 %v7739_v24  ;;  %v7769_v24 = vld [vmem:[%s8148_s29 + $0x658] sm:$0xff] }
  0xc0   : > { %4865 = vmatpush.bf16.msrb.mxu2 %v7747_v25  ;;  %v7777_v25 = vld [vmem:[%s8148_s29 + $0x698] sm:$0xff] }
  0xc1   : > { %4878 = vmatpush.bf16.msrb.mxu3 %v7755_v26  ;;  %v7785_v26 = vld [vmem:[%s8148_s29 + $0x6d8] sm:$0xff] }
  0xc2   : > { %4840 = vmatpush.bf16.msrb.mxu0 %v7730_v28  ;;  %v4614_v53 = vpop.f32.mrf.mxu2 }
  0xc3   : > { %4853 = vmatpush.bf16.msrb.mxu1 %v7738_v29  ;;  %v4627_v54 = vpop.f32.mrf.mxu3  ;;  %v308_v53 = vld.sshfl [vmem:[#allocation1 + $0x18] sm:$0xff pattern:$0x73625140] }
  0xc4   : > { %4866 = vmatpush.bf16.msrb.mxu2 %v7746_v31  ;;  %v7760_v31 = vld [vmem:[%s8148_s29 + $0x610] sm:$0xff]  ;;  %v7813_v54 = vld [vmem:[%s8148_s29 + $0x7b8] sm:$0xff] }
  0xc5   : > { %4879 = vmatpush.bf16.msrb.mxu3 %v7754_v32  ;;  %v7768_v32 = vld [vmem:[%s8148_s29 + $0x650] sm:$0xff]  ;;  %v309_v39 = vld.sshfl [vmem:[#allocation1 + $0x20] sm:$0xff pattern:$0x73625140] }
  0xc6   : > { %4841 = vmatpush.bf16.msrb.mxu0 %v7729_v34 }
  0xc7   : > { %4854 = vmatpush.bf16.msrb.mxu1 %v7737_v35  ;;  %v7776_v35 = vld [vmem:[%s8148_s29 + $0x690] sm:$0xff] }
  0xc8   : > { %4867 = vmatpush.bf16.msrb.mxu2 %v7745_v36  ;;  %v7784_v36 = vld [vmem:[%s8148_s29 + $0x6d0] sm:$0xff] }
  0xc9   : > { %4880 = vmatpush.bf16.msrb.mxu3 %v7753_v37  ;;  %v7759_v37 = vld [vmem:[%s8148_s29 + $0x608] sm:$0xff] }
  0xca   : > { %4842 = vmatpush.bf16.msrb.mxu0 %v7728_v42 }
  0xcb   : > { %4855 = vmatpush.bf16.msrb.mxu1 %v7736_v43 }
  0xcc   : > { %4868 = vmatpush.bf16.msrb.mxu2 %v7744_v46  ;;  %v7774_v46 = vld [vmem:[%s8148_s29 + $0x680] sm:$0xff] }
  0xcd   : > { %4881 = vmatpush.bf16.msrb.mxu3 %v7752_v47  ;;  %v7782_v47 = vld [vmem:[%s8148_s29 + $0x6c0] sm:$0xff] }
  0xce   : > { %4843 = vmatpush.bf16.msrb.mxu0 %v7727_v48  ;;  %v7797_v48 = vld [vmem:[%s8148_s29 + $0x738] sm:$0xff] }
  0xcf   : > { %4856 = vmatpush.bf16.msrb.mxu1 %v7735_v49  ;;  %v7805_v49 = vld [vmem:[%s8148_s29 + $0x778] sm:$0xff] }
  0xd0   : > { %4869 = vmatpush.bf16.msrb.mxu2 %v7743_v51  ;;  %v307_v51 = vld.sshfl [vmem:[#allocation1 + $0x10] sm:$0xff pattern:$0x73625140] }
  0xd1   : > { %4882 = vmatpush.bf16.msrb.mxu3 %v7751_v52  ;;  %v306_v52 = vld.sshfl [vmem:[#allocation1 + $0x8] sm:$0xff pattern:$0x73625140] }
  0xd2   : > { %4844 = vmatpush.bf16.msrb.mxu0 %v7726_v55  ;;  %v4638_v15 = vpop.f32.mrf.mxu0  ;;  %v7821_v55 = vld [vmem:[%s8148_s29 + $0x7f8] sm:$0xff] }
  0xd3   : > { %4857 = vmatpush.bf16.msrb.mxu1 %v7734_v56  ;;  %v4639_v18 = vadd.f32 %v4638_v15, %v8387_v44  ;;  %v4651_v19 = vpop.f32.mrf.mxu1  ;;  %v7758_v44 = vld [vmem:[%s8148_s29 + $0x600] sm:$0xff]  ;;  %v441_v56 = vpack.c.bf16 %v305_v50, %v305_v50  ;;  %v7817_v15 = vld [vmem:[%s8148_s29 + $0x7d8] sm:$0xff]  ;;  %v7836_v50 = vld [vmem:[%s8148_s29 + $0x870] sm:$0xff] }
  0xd4   : > { %4870 = vmatpush.bf16.msrb.mxu2 %v7742_v57  ;;  %v443_v57 = vpack.c.bf16 %v307_v51, %v307_v51  ;;  %v7844_v51 = vld [vmem:[%s8148_s29 + $0x8b0] sm:$0xff] }
  0xd5   : > { %4883 = vmatpush.bf16.msrb.mxu3 %v7750_v58  ;;  %4845 = vmatmul.bf16.vlgmr.msrb.gmra.mxu0 %v437_v3  ;;  %v4652_v22 = vadd.f32 %v4651_v19, %v4639_v18  ;;  %v442_v58 = vpack.c.bf16 %v306_v52, %v306_v52  ;;  %v7819_v3 = vld [vmem:[%s8148_s29 + $0x7e8] sm:$0xff]  ;;  %v7852_v52 = vld [vmem:[%s8148_s29 + $0x8f0] sm:$0xff] }
  0xd6   : > { %4889 = vmatpush.bf16.msra.mxu0 %v7765_v59  ;;  %4858 = vmatmul.bf16.vlgmr.msrb.gmra.mxu1 %v438_v5  ;;  %v444_v59 = vpack.c.bf16 %v308_v53, %v308_v53  ;;  %v7827_v53 = vld [vmem:[%s8148_s29 + $0x828] sm:$0xff] }
  0xd7   : > { %4902 = vmatpush.bf16.msra.mxu1 %v7773_v60  ;;  %4871 = vmatmul.bf16.vlgmr.msrb.gmra.mxu2 %v439_v4  ;;  %v7796_v60 = vld [vmem:[%s8148_s29 + $0x730] sm:$0xff] }
  0xd8   : > { %4915 = vmatpush.bf16.msra.mxu2 %v7781_v1  ;;  %4884 = vmatmul.bf16.vlgmr.msrb.gmra.mxu3 %v440_v6  ;;  %v7803_v1 = vld [vmem:[%s8148_s29 + $0x768] sm:$0xff]  ;;  %v7794_v6 = vld [vmem:[%s8148_s29 + $0x720] sm:$0xff] }
  0xd9   : > { %4928 = vmatpush.bf16.msra.mxu3 %v7789_v2  ;;  %v7811_v2 = vld [vmem:[%s8148_s29 + $0x7a8] sm:$0xff] }
  0xda   : > { %4890 = vmatpush.bf16.msra.mxu0 %v7764_v7  ;;  %v4664_v27 = vpop.f32.mrf.mxu2  ;;  %v4640_v30 = vpop.f32.mrf.mxu0  ;;  %v7802_v7 = vld [vmem:[%s8148_s29 + $0x760] sm:$0xff] }
  0xdb   : > { %4903 = vmatpush.bf16.msra.mxu1 %v7772_v8  ;;  %v4665_v28 = vadd.f32 %v4664_v27, %v4652_v22  ;;  %v4677_v29 = vpop.f32.mrf.mxu3  ;;  %v4653_v34 = vpop.f32.mrf.mxu1  ;;  %v7800_v22 = vld [vmem:[%s8148_s29 + $0x750] sm:$0xff]  ;;  %v7799_v27 = vld [vmem:[%s8148_s29 + $0x748] sm:$0xff] }
  0xdc   : > { %4916 = vmatpush.bf16.msra.mxu2 %v7780_v9  ;;  %v7810_v9 = vld [vmem:[%s8148_s29 + $0x7a0] sm:$0xff]  ;;  %v7815_v30 = vld [vmem:[%s8148_s29 + $0x7c8] sm:$0xff] }
  0xdd   : > { %4929 = vmatpush.bf16.msra.mxu3 %v7788_v10  ;;  %v8423_v33 = vadd.f32 %v4677_v29, %v4665_v28  ;;  %v7818_v10 = vld [vmem:[%s8148_s29 + $0x7e0] sm:$0xff]  ;;  %v7807_v29 = vld [vmem:[%s8148_s29 + $0x788] sm:$0xff] }
  0xde   : > { %4891 = vmatpush.bf16.msra.mxu0 %v7763_v11  ;;  %v248_v28 = vld [vmem:[%s8143_s25 + $0x40] sm:$0xff] }
  0xdf   : > { %4904 = vmatpush.bf16.msra.mxu1 %v7771_v12  ;;  %v7793_v12 = vld [vmem:[%s8148_s29 + $0x718] sm:$0xff]  ;;  %313 = vst [vmem:[#allocation1] ss:$4 sm:$0xff] %v248_v28  ;;  %v7798_v34 = vld [vmem:[%s8148_s29 + $0x740] sm:$0xff] }
  0xe0   : > { %4917 = vmatpush.bf16.msra.mxu2 %v7779_v13  ;;  %v7801_v13 = vld [vmem:[%s8148_s29 + $0x758] sm:$0xff] }
  0xe1   : > { %4930 = vmatpush.bf16.msra.mxu3 %v7787_v14  ;;  %v7809_v14 = vld [vmem:[%s8148_s29 + $0x798] sm:$0xff] }
  0xe2   : > { %4892 = vmatpush.bf16.msra.mxu0 %v7762_v16  ;;  %v4666_v42 = vpop.f32.mrf.mxu2 }
  0xe3   : > { %4905 = vmatpush.bf16.msra.mxu1 %v7770_v17  ;;  %v4679_v43 = vpop.f32.mrf.mxu3  ;;  %v312_v42 = vld.sshfl [vmem:[#allocation1 + $0x38] sm:$0xff pattern:$0x73625140] }
  0xe4   : > { %4918 = vmatpush.bf16.msra.mxu2 %v7778_v20  ;;  %v7845_v43 = vld [vmem:[%s8148_s29 + $0x8b8] sm:$0xff] }
  0xe5   : > { %4931 = vmatpush.bf16.msra.mxu3 %v7786_v21  ;;  %v7792_v21 = vld [vmem:[%s8148_s29 + $0x710] sm:$0xff] }
  0xe6   : > { %4893 = vmatpush.bf16.msra.mxu0 %v7761_v23  ;;  %v315_v28 = vld.sshfl [vmem:[#allocation1] sm:$0xff pattern:$0x73625140] }
  0xe7   : > { %4906 = vmatpush.bf16.msra.mxu1 %v7769_v24  ;;  %v7808_v24 = vld [vmem:[%s8148_s29 + $0x790] sm:$0xff] }
  0xe8   : > { %4919 = vmatpush.bf16.msra.mxu2 %v7777_v25  ;;  %v7816_v25 = vld [vmem:[%s8148_s29 + $0x7d0] sm:$0xff] }
  0xe9   : > { %4932 = vmatpush.bf16.msra.mxu3 %v7785_v26  ;;  %v7791_v26 = vld [vmem:[%s8148_s29 + $0x708] sm:$0xff] }
  0xea   : > { %4894 = vmatpush.bf16.msra.mxu0 %v7760_v31 }
  0xeb   : > { %4907 = vmatpush.bf16.msra.mxu1 %v7768_v32 }
  0xec   : > { %4920 = vmatpush.bf16.msra.mxu2 %v7776_v35  ;;  %v7806_v35 = vld [vmem:[%s8148_s29 + $0x780] sm:$0xff] }
  0xed   : > { %4933 = vmatpush.bf16.msra.mxu3 %v7784_v36  ;;  %v7814_v36 = vld [vmem:[%s8148_s29 + $0x7c0] sm:$0xff] }
  0xee   : > { %4895 = vmatpush.bf16.msra.mxu0 %v7759_v37  ;;  %v7829_v37 = vld [vmem:[%s8148_s29 + $0x838] sm:$0xff] }
  0xef   : > { %4908 = vmatpush.bf16.msra.mxu1 %v7767_v38  ;;  %v7837_v38 = vld [vmem:[%s8148_s29 + $0x878] sm:$0xff] }
  0xf0   : > { %4921 = vmatpush.bf16.msra.mxu2 %v7775_v40  ;;  %v311_v40 = vld.sshfl [vmem:[#allocation1 + $0x30] sm:$0xff pattern:$0x73625140] }
  0xf1   : > { %4934 = vmatpush.bf16.msra.mxu3 %v7783_v41  ;;  %v310_v41 = vld.sshfl [vmem:[#allocation1 + $0x28] sm:$0xff pattern:$0x73625140] }
  0xf2   : > { %4896 = vmatpush.bf16.msra.mxu0 %v7758_v44  ;;  %v4690_v4 = vpop.f32.mrf.mxu0  ;;  %v7853_v44 = vld [vmem:[%s8148_s29 + $0x8f8] sm:$0xff] }
  0xf3   : > { %4909 = vmatpush.bf16.msra.mxu1 %v7766_v45  ;;  %v4691_v5 = vadd.f32 %v4690_v4, %v8423_v33  ;;  %v4703_v8 = vpop.f32.mrf.mxu1  ;;  %v7790_v33 = vld [vmem:[%s8148_s29 + $0x700] sm:$0xff]  ;;  %v445_v45 = vpack.c.bf16 %v309_v39, %v309_v39  ;;  %v7849_v4 = vld [vmem:[%s8148_s29 + $0x8d8] sm:$0xff]  ;;  %v7868_v39 = vld [vmem:[%s8148_s29 + $0x970] sm:$0xff] }
  0xf4   : > { %4922 = vmatpush.bf16.msra.mxu2 %v7774_v46  ;;  %v447_v46 = vpack.c.bf16 %v311_v40, %v311_v40  ;;  %v7876_v40 = vld [vmem:[%s8148_s29 + $0x9b0] sm:$0xff] }
  0xf5   : > { %4935 = vmatpush.bf16.msra.mxu3 %v7782_v47  ;;  %4897 = vmatmul.bf16.vlgmr.msra.gmra.mxu0 %v441_v56  ;;  %v4704_v11 = vadd.f32 %v4703_v8, %v4691_v5  ;;  %v446_v47 = vpack.c.bf16 %v310_v41, %v310_v41  ;;  %v7851_v56 = vld [vmem:[%s8148_s29 + $0x8e8] sm:$0xff]  ;;  %v7884_v41 = vld [vmem:[%s8148_s29 + $0x9f0] sm:$0xff] }
  0xf6   : > { %4941 = vmatpush.bf16.msrb.mxu0 %v7797_v48  ;;  %4910 = vmatmul.bf16.vlgmr.msra.gmra.mxu1 %v442_v58  ;;  %v448_v48 = vpack.c.bf16 %v312_v42, %v312_v42  ;;  %v7859_v42 = vld [vmem:[%s8148_s29 + $0x928] sm:$0xff] }
  0xf7   : > { %4954 = vmatpush.bf16.msrb.mxu1 %v7805_v49  ;;  %4923 = vmatmul.bf16.vlgmr.msra.gmra.mxu2 %v443_v57  ;;  %v7828_v49 = vld [vmem:[%s8148_s29 + $0x830] sm:$0xff] }
  0xf8   : > { %4967 = vmatpush.bf16.msrb.mxu2 %v7813_v54  ;;  %4936 = vmatmul.bf16.vlgmr.msra.gmra.mxu3 %v444_v59  ;;  %v7835_v54 = vld [vmem:[%s8148_s29 + $0x868] sm:$0xff]  ;;  %v7826_v59 = vld [vmem:[%s8148_s29 + $0x820] sm:$0xff] }
  0xf9   : > { %4980 = vmatpush.bf16.msrb.mxu3 %v7821_v55  ;;  %v7843_v55 = vld [vmem:[%s8148_s29 + $0x8a8] sm:$0xff] }
  0xfa   : > { %4942 = vmatpush.bf16.msrb.mxu0 %v7796_v60  ;;  %v4716_v16 = vpop.f32.mrf.mxu2  ;;  %v4692_v19 = vpop.f32.mrf.mxu0  ;;  %v7834_v60 = vld [vmem:[%s8148_s29 + $0x860] sm:$0xff] }
  0xfb   : > { %4955 = vmatpush.bf16.msrb.mxu1 %v7804_v61  ;;  %v4717_v17 = vadd.f32 %v4716_v16, %v4704_v11  ;;  %v4729_v18 = vpop.f32.mrf.mxu3  ;;  %v4705_v23 = vpop.f32.mrf.mxu1  ;;  %v7832_v11 = vld [vmem:[%s8148_s29 + $0x850] sm:$0xff]  ;;  %v7831_v16 = vld [vmem:[%s8148_s29 + $0x848] sm:$0xff] }
  0xfc   : > { %4968 = vmatpush.bf16.msrb.mxu2 %v7812_v62  ;;  %v7842_v62 = vld [vmem:[%s8148_s29 + $0x8a0] sm:$0xff]  ;;  %v7847_v19 = vld [vmem:[%s8148_s29 + $0x8c8] sm:$0xff] }
  0xfd   : > { %4981 = vmatpush.bf16.msrb.mxu3 %v7820_v63  ;;  %v8457_v20 = vadd.f32 %v4729_v18, %v4717_v17  ;;  %v7850_v63 = vld [vmem:[%s8148_s29 + $0x8e0] sm:$0xff]  ;;  %v249_v17 = vld [vmem:[%s8143_s25 + $0x48] sm:$0xff] }
  0xfe   : > { %4943 = vmatpush.bf16.msrb.mxu0 %v7795_v0  ;;  %v7839_v18 = vld [vmem:[%s8148_s29 + $0x888] sm:$0xff]  ;;  %314 = vst [vmem:[#allocation1 + $0x20] ss:$4 sm:$0xff] %v249_v17  ;;  %v7830_v23 = vld [vmem:[%s8148_s29 + $0x840] sm:$0xff] }
  0xff   : > { %4956 = vmatpush.bf16.msrb.mxu1 %v7803_v1  ;;  %v7825_v1 = vld [vmem:[%s8148_s29 + $0x818] sm:$0xff] }
 0x100   : > { %4969 = vmatpush.bf16.msrb.mxu2 %v7811_v2  ;;  %v7833_v2 = vld [vmem:[%s8148_s29 + $0x858] sm:$0xff] }
 0x101   : > { %4982 = vmatpush.bf16.msrb.mxu3 %v7819_v3  ;;  %v7841_v3 = vld [vmem:[%s8148_s29 + $0x898] sm:$0xff] }
 0x102   : > { %4944 = vmatpush.bf16.msrb.mxu0 %v7794_v6  ;;  %v4718_v31 = vpop.f32.mrf.mxu2 }
 0x103   : > { %4957 = vmatpush.bf16.msrb.mxu1 %v7802_v7  ;;  %v4731_v32 = vpop.f32.mrf.mxu3  ;;  %v318_v31 = vld.sshfl [vmem:[#allocation1 + $0x18] sm:$0xff pattern:$0x73625140] }
 0x104   : > { %4970 = vmatpush.bf16.msrb.mxu2 %v7810_v9  ;;  %v7877_v32 = vld [vmem:[%s8148_s29 + $0x9b8] sm:$0xff] }
 0x105   : > { %4983 = vmatpush.bf16.msrb.mxu3 %v7818_v10  ;;  %v7824_v10 = vld [vmem:[%s8148_s29 + $0x810] sm:$0xff]  ;;  %v319_v17 = vld.sshfl [vmem:[#allocation1 + $0x20] sm:$0xff pattern:$0x73625140] }
 0x106   : > { %4945 = vmatpush.bf16.msrb.mxu0 %v7793_v12 }
 0x107   : > { %4958 = vmatpush.bf16.msrb.mxu1 %v7801_v13  ;;  %v7840_v13 = vld [vmem:[%s8148_s29 + $0x890] sm:$0xff] }
 0x108   : > { %4971 = vmatpush.bf16.msrb.mxu2 %v7809_v14  ;;  %v7848_v14 = vld [vmem:[%s8148_s29 + $0x8d0] sm:$0xff] }
 0x109   : > { %4984 = vmatpush.bf16.msrb.mxu3 %v7817_v15  ;;  %v7823_v15 = vld [vmem:[%s8148_s29 + $0x808] sm:$0xff] }
 0x10a   : > { %4946 = vmatpush.bf16.msrb.mxu0 %v7792_v21 }
 0x10b   : > { %4959 = vmatpush.bf16.msrb.mxu1 %v7800_v22  ;;  %v7822_v22 = vld [vmem:[%s8148_s29 + $0x800] sm:$0xff] }
 0x10c   : > { %4972 = vmatpush.bf16.msrb.mxu2 %v7808_v24  ;;  %v7838_v24 = vld [vmem:[%s8148_s29 + $0x880] sm:$0xff] }
 0x10d   : > { %4985 = vmatpush.bf16.msrb.mxu3 %v7816_v25  ;;  %v7846_v25 = vld [vmem:[%s8148_s29 + $0x8c0] sm:$0xff] }
 0x10e   : > { %4947 = vmatpush.bf16.msrb.mxu0 %v7791_v26  ;;  %v7861_v26 = vld [vmem:[%s8148_s29 + $0x938] sm:$0xff] }
 0x10f   : > { %4960 = vmatpush.bf16.msrb.mxu1 %v7799_v27  ;;  %v7869_v27 = vld [vmem:[%s8148_s29 + $0x978] sm:$0xff] }
 0x110   : > { %4973 = vmatpush.bf16.msrb.mxu2 %v7807_v29  ;;  %v317_v29 = vld.sshfl [vmem:[#allocation1 + $0x10] sm:$0xff pattern:$0x73625140] }
 0x111   : > { %4986 = vmatpush.bf16.msrb.mxu3 %v7815_v30  ;;  %v316_v30 = vld.sshfl [vmem:[#allocation1 + $0x8] sm:$0xff pattern:$0x73625140] }
 0x112   : > { %4948 = vmatpush.bf16.msrb.mxu0 %v7790_v33  ;;  %v4742_v57 = vpop.f32.mrf.mxu0  ;;  %v7885_v33 = vld [vmem:[%s8148_s29 + $0x9f8] sm:$0xff] }
 0x113   : > { %4961 = vmatpush.bf16.msrb.mxu1 %v7798_v34  ;;  %v4743_v58 = vadd.f32 %v4742_v57, %v8457_v20  ;;  %v4755_v61 = vpop.f32.mrf.mxu1  ;;  %v449_v34 = vpack.c.bf16 %v315_v28, %v315_v28  ;;  %v7881_v57 = vld [vmem:[%s8148_s29 + $0x9d8] sm:$0xff]  ;;  %v7900_v28 = vld [vmem:[%s8148_s29 + $0xa70] sm:$0xff] }
 0x114   : > { %4974 = vmatpush.bf16.msrb.mxu2 %v7806_v35  ;;  %v451_v35 = vpack.c.bf16 %v317_v29, %v317_v29  ;;  %v7908_v29 = vld [vmem:[%s8148_s29 + $0xab0] sm:$0xff] }
 0x115   : > { %4987 = vmatpush.bf16.msrb.mxu3 %v7814_v36  ;;  %4949 = vmatmul.bf16.vlgmr.msrb.gmra.mxu0 %v445_v45  ;;  %v4756_v0 = vadd.f32 %v4755_v61, %v4743_v58  ;;  %v450_v36 = vpack.c.bf16 %v316_v30, %v316_v30  ;;  %v7883_v45 = vld [vmem:[%s8148_s29 + $0x9e8] sm:$0xff]  ;;  %v7916_v30 = vld [vmem:[%s8148_s29 + $0xaf0] sm:$0xff] }
 0x116   : > { %4993 = vmatpush.bf16.msra.mxu0 %v7829_v37  ;;  %4962 = vmatmul.bf16.vlgmr.msrb.gmra.mxu1 %v446_v47  ;;  %v452_v37 = vpack.c.bf16 %v318_v31, %v318_v31  ;;  %v7891_v31 = vld [vmem:[%s8148_s29 + $0xa28] sm:$0xff] }
 0x117   : > { %5006 = vmatpush.bf16.msra.mxu1 %v7837_v38  ;;  %4975 = vmatmul.bf16.vlgmr.msrb.gmra.mxu2 %v447_v46  ;;  %v7860_v38 = vld [vmem:[%s8148_s29 + $0x930] sm:$0xff] }
 0x118   : > { %5019 = vmatpush.bf16.msra.mxu2 %v7845_v43  ;;  %4988 = vmatmul.bf16.vlgmr.msrb.gmra.mxu3 %v448_v48  ;;  %v7867_v43 = vld [vmem:[%s8148_s29 + $0x968] sm:$0xff]  ;;  %v7858_v48 = vld [vmem:[%s8148_s29 + $0x920] sm:$0xff] }
 0x119   : > { %5032 = vmatpush.bf16.msra.mxu3 %v7853_v44  ;;  %v7875_v44 = vld [vmem:[%s8148_s29 + $0x9a8] sm:$0xff] }
 0x11a   : > { %4994 = vmatpush.bf16.msra.mxu0 %v7828_v49  ;;  %v4768_v5 = vpop.f32.mrf.mxu2  ;;  %v4744_v8 = vpop.f32.mrf.mxu0  ;;  %v7866_v49 = vld [vmem:[%s8148_s29 + $0x960] sm:$0xff] }
 0x11b   : > { %5007 = vmatpush.bf16.msra.mxu1 %v7836_v50  ;;  %v4769_v6 = vadd.f32 %v4768_v5, %v4756_v0  ;;  %v4781_v7 = vpop.f32.mrf.mxu3  ;;  %v4757_v12 = vpop.f32.mrf.mxu1  ;;  %v7864_v0 = vld [vmem:[%s8148_s29 + $0x950] sm:$0xff]  ;;  %v7863_v5 = vld [vmem:[%s8148_s29 + $0x948] sm:$0xff] }
 0x11c   : > { %5020 = vmatpush.bf16.msra.mxu2 %v7844_v51  ;;  %v7874_v51 = vld [vmem:[%s8148_s29 + $0x9a0] sm:$0xff]  ;;  %v7879_v8 = vld [vmem:[%s8148_s29 + $0x9c8] sm:$0xff] }
 0x11d   : > { %5033 = vmatpush.bf16.msra.mxu3 %v7852_v52  ;;  %v8493_v9 = vadd.f32 %v4781_v7, %v4769_v6  ;;  %v7882_v52 = vld [vmem:[%s8148_s29 + $0x9e0] sm:$0xff]  ;;  %v250_v6 = vld [vmem:[%s8143_s25 + $0x50] sm:$0xff]  ;;  %v7871_v7 = vld [vmem:[%s8148_s29 + $0x988] sm:$0xff] }
 0x11e   : > { %4995 = vmatpush.bf16.msra.mxu0 %v7827_v53  ;;  %323 = vst [vmem:[#allocation1] ss:$4 sm:$0xff] %v250_v6  ;;  %v7862_v12 = vld [vmem:[%s8148_s29 + $0x940] sm:$0xff] }
 0x11f   : > { %5008 = vmatpush.bf16.msra.mxu1 %v7835_v54  ;;  %v7857_v54 = vld [vmem:[%s8148_s29 + $0x918] sm:$0xff] }
 0x120   : > { %5021 = vmatpush.bf16.msra.mxu2 %v7843_v55  ;;  %v7865_v55 = vld [vmem:[%s8148_s29 + $0x958] sm:$0xff] }
 0x121   : > { %5034 = vmatpush.bf16.msra.mxu3 %v7851_v56  ;;  %v7873_v56 = vld [vmem:[%s8148_s29 + $0x998] sm:$0xff] }
 0x122   : > { %4996 = vmatpush.bf16.msra.mxu0 %v7826_v59  ;;  %v4770_v20 = vpop.f32.mrf.mxu2 }
 0x123   : > { %5009 = vmatpush.bf16.msra.mxu1 %v7834_v60  ;;  %v4783_v21 = vpop.f32.mrf.mxu3  ;;  %v322_v20 = vld.sshfl [vmem:[#allocation1 + $0x38] sm:$0xff pattern:$0x73625140] }
 0x124   : > { %5022 = vmatpush.bf16.msra.mxu2 %v7842_v62  ;;  %v7909_v21 = vld [vmem:[%s8148_s29 + $0xab8] sm:$0xff] }
 0x125   : > { %5035 = vmatpush.bf16.msra.mxu3 %v7850_v63  ;;  %v7856_v63 = vld [vmem:[%s8148_s29 + $0x910] sm:$0xff]  ;;  %v325_v6 = vld.sshfl [vmem:[#allocation1] sm:$0xff pattern:$0x73625140] }
 0x126   : > { %4997 = vmatpush.bf16.msra.mxu0 %v7825_v1 }
 0x127   : > { %5010 = vmatpush.bf16.msra.mxu1 %v7833_v2  ;;  %v7872_v2 = vld [vmem:[%s8148_s29 + $0x990] sm:$0xff] }
 0x128   : > { %5023 = vmatpush.bf16.msra.mxu2 %v7841_v3  ;;  %v7880_v3 = vld [vmem:[%s8148_s29 + $0x9d0] sm:$0xff] }
 0x129   : > { %5036 = vmatpush.bf16.msra.mxu3 %v7849_v4  ;;  %v7855_v4 = vld [vmem:[%s8148_s29 + $0x908] sm:$0xff] }
 0x12a   : > { %4998 = vmatpush.bf16.msra.mxu0 %v7824_v10 }
 0x12b   : > { %5011 = vmatpush.bf16.msra.mxu1 %v7832_v11  ;;  %v7854_v11 = vld [vmem:[%s8148_s29 + $0x900] sm:$0xff] }
 0x12c   : > { %5024 = vmatpush.bf16.msra.mxu2 %v7840_v13  ;;  %v7870_v13 = vld [vmem:[%s8148_s29 + $0x980] sm:$0xff] }
 0x12d   : > { %5037 = vmatpush.bf16.msra.mxu3 %v7848_v14  ;;  %v7878_v14 = vld [vmem:[%s8148_s29 + $0x9c0] sm:$0xff] }
 0x12e   : > { %4999 = vmatpush.bf16.msra.mxu0 %v7823_v15  ;;  %v7893_v15 = vld [vmem:[%s8148_s29 + $0xa38] sm:$0xff] }
 0x12f   : > { %5012 = vmatpush.bf16.msra.mxu1 %v7831_v16  ;;  %v7901_v16 = vld [vmem:[%s8148_s29 + $0xa78] sm:$0xff] }
 0x130   : > { %5025 = vmatpush.bf16.msra.mxu2 %v7839_v18  ;;  %v321_v18 = vld.sshfl [vmem:[#allocation1 + $0x30] sm:$0xff pattern:$0x73625140] }
 0x131   : > { %5038 = vmatpush.bf16.msra.mxu3 %v7847_v19  ;;  %v320_v19 = vld.sshfl [vmem:[#allocation1 + $0x28] sm:$0xff pattern:$0x73625140] }
 0x132   : > { %5000 = vmatpush.bf16.msra.mxu0 %v7822_v22  ;;  %v4794_v46 = vpop.f32.mrf.mxu0  ;;  %v7917_v22 = vld [vmem:[%s8148_s29 + $0xaf8] sm:$0xff] }
 0x133   : > { %5013 = vmatpush.bf16.msra.mxu1 %v7830_v23  ;;  %v4795_v47 = vadd.f32 %v4794_v46, %v8493_v9  ;;  %v4807_v50 = vpop.f32.mrf.mxu1  ;;  %v453_v23 = vpack.c.bf16 %v319_v17, %v319_v17  ;;  %v7913_v46 = vld [vmem:[%s8148_s29 + $0xad8] sm:$0xff]  ;;  %v7932_v17 = vld [vmem:[%s8148_s29 + $0xb70] sm:$0xff] }
 0x134   : > { %5026 = vmatpush.bf16.msra.mxu2 %v7838_v24  ;;  %v455_v24 = vpack.c.bf16 %v321_v18, %v321_v18  ;;  %v7940_v18 = vld [vmem:[%s8148_s29 + $0xbb0] sm:$0xff] }
 0x135   : > { %5039 = vmatpush.bf16.msra.mxu3 %v7846_v25  ;;  %5001 = vmatmul.bf16.vlgmr.msra.gmra.mxu0 %v449_v34  ;;  %v4808_v53 = vadd.f32 %v4807_v50, %v4795_v47  ;;  %v454_v25 = vpack.c.bf16 %v320_v19, %v320_v19  ;;  %v7915_v34 = vld [vmem:[%s8148_s29 + $0xae8] sm:$0xff]  ;;  %v7948_v19 = vld [vmem:[%s8148_s29 + $0xbf0] sm:$0xff] }
 0x136   : > { %5045 = vmatpush.bf16.msrb.mxu0 %v7861_v26  ;;  %5014 = vmatmul.bf16.vlgmr.msra.gmra.mxu1 %v450_v36  ;;  %v456_v26 = vpack.c.bf16 %v322_v20, %v322_v20  ;;  %v7923_v20 = vld [vmem:[%s8148_s29 + $0xb28] sm:$0xff] }
 0x137   : > { %5058 = vmatpush.bf16.msrb.mxu1 %v7869_v27  ;;  %5027 = vmatmul.bf16.vlgmr.msra.gmra.mxu2 %v451_v35  ;;  %v7892_v27 = vld [vmem:[%s8148_s29 + $0xa30] sm:$0xff] }
 0x138   : > { %5071 = vmatpush.bf16.msrb.mxu2 %v7877_v32  ;;  %5040 = vmatmul.bf16.vlgmr.msra.gmra.mxu3 %v452_v37  ;;  %v7899_v32 = vld [vmem:[%s8148_s29 + $0xa68] sm:$0xff]  ;;  %v7890_v37 = vld [vmem:[%s8148_s29 + $0xa20] sm:$0xff] }
 0x139   : > { %5084 = vmatpush.bf16.msrb.mxu3 %v7885_v33  ;;  %v7907_v33 = vld [vmem:[%s8148_s29 + $0xaa8] sm:$0xff] }
 0x13a   : > { %5046 = vmatpush.bf16.msrb.mxu0 %v7860_v38  ;;  %v4820_v58 = vpop.f32.mrf.mxu2  ;;  %v4796_v61 = vpop.f32.mrf.mxu0  ;;  %v7898_v38 = vld [vmem:[%s8148_s29 + $0xa60] sm:$0xff] }
 0x13b   : > { %5059 = vmatpush.bf16.msrb.mxu1 %v7868_v39  ;;  %v4821_v59 = vadd.f32 %v4820_v58, %v4808_v53  ;;  %v4833_v60 = vpop.f32.mrf.mxu3  ;;  %v4809_v1 = vpop.f32.mrf.mxu1  ;;  %v7896_v53 = vld [vmem:[%s8148_s29 + $0xa50] sm:$0xff]  ;;  %v7895_v58 = vld [vmem:[%s8148_s29 + $0xa48] sm:$0xff] }
 0x13c   : > { %5072 = vmatpush.bf16.msrb.mxu2 %v7876_v40  ;;  %v7906_v40 = vld [vmem:[%s8148_s29 + $0xaa0] sm:$0xff]  ;;  %v7911_v61 = vld [vmem:[%s8148_s29 + $0xac8] sm:$0xff] }
 0x13d   : > { %5085 = vmatpush.bf16.msrb.mxu3 %v7884_v41  ;;  %v8529_v62 = vadd.f32 %v4833_v60, %v4821_v59  ;;  %v7914_v41 = vld [vmem:[%s8148_s29 + $0xae0] sm:$0xff]  ;;  %v251_v59 = vld [vmem:[%s8143_s25 + $0x58] sm:$0xff]  ;;  %v7903_v60 = vld [vmem:[%s8148_s29 + $0xa88] sm:$0xff] }
 0x13e   : > { %5047 = vmatpush.bf16.msrb.mxu0 %v7859_v42  ;;  %324 = vst [vmem:[#allocation1 + $0x20] ss:$4 sm:$0xff] %v251_v59  ;;  %v7894_v1 = vld [vmem:[%s8148_s29 + $0xa40] sm:$0xff] }
 0x13f   : > { %5060 = vmatpush.bf16.msrb.mxu1 %v7867_v43  ;;  %v7889_v43 = vld [vmem:[%s8148_s29 + $0xa18] sm:$0xff] }
 0x140   : > { %5073 = vmatpush.bf16.msrb.mxu2 %v7875_v44  ;;  %v7897_v44 = vld [vmem:[%s8148_s29 + $0xa58] sm:$0xff] }
 0x141   : > { %5086 = vmatpush.bf16.msrb.mxu3 %v7883_v45  ;;  %v7905_v45 = vld [vmem:[%s8148_s29 + $0xa98] sm:$0xff] }
 0x142   : > { %5048 = vmatpush.bf16.msrb.mxu0 %v7858_v48  ;;  %v4822_v9 = vpop.f32.mrf.mxu2 }
 0x143   : > { %5061 = vmatpush.bf16.msrb.mxu1 %v7866_v49  ;;  %v4835_v10 = vpop.f32.mrf.mxu3  ;;  %v328_v9 = vld.sshfl [vmem:[#allocation1 + $0x18] sm:$0xff pattern:$0x73625140] }
 0x144   : > { %5074 = vmatpush.bf16.msrb.mxu2 %v7874_v51  ;;  %v7941_v10 = vld [vmem:[%s8148_s29 + $0xbb8] sm:$0xff] }
 0x145   : > { %5087 = vmatpush.bf16.msrb.mxu3 %v7882_v52  ;;  %v7888_v52 = vld [vmem:[%s8148_s29 + $0xa10] sm:$0xff]  ;;  %v329_v59 = vld.sshfl [vmem:[#allocation1 + $0x20] sm:$0xff pattern:$0x73625140] }
 0x146   : > { %5049 = vmatpush.bf16.msrb.mxu0 %v7857_v54 }
 0x147   : > { %5062 = vmatpush.bf16.msrb.mxu1 %v7865_v55  ;;  %v7904_v55 = vld [vmem:[%s8148_s29 + $0xa90] sm:$0xff] }
 0x148   : > { %5075 = vmatpush.bf16.msrb.mxu2 %v7873_v56  ;;  %v7912_v56 = vld [vmem:[%s8148_s29 + $0xad0] sm:$0xff] }
 0x149   : > { %5088 = vmatpush.bf16.msrb.mxu3 %v7881_v57  ;;  %v7887_v57 = vld [vmem:[%s8148_s29 + $0xa08] sm:$0xff] }
 0x14a   : > { %5050 = vmatpush.bf16.msrb.mxu0 %v7856_v63 }
 0x14b   : > { %5063 = vmatpush.bf16.msrb.mxu1 %v7864_v0  ;;  %v7886_v0 = vld [vmem:[%s8148_s29 + $0xa00] sm:$0xff] }
 0x14c   : > { %5076 = vmatpush.bf16.msrb.mxu2 %v7872_v2  ;;  %v7902_v2 = vld [vmem:[%s8148_s29 + $0xa80] sm:$0xff] }
 0x14d   : > { %5089 = vmatpush.bf16.msrb.mxu3 %v7880_v3  ;;  %v7910_v3 = vld [vmem:[%s8148_s29 + $0xac0] sm:$0xff] }
 0x14e   : > { %5051 = vmatpush.bf16.msrb.mxu0 %v7855_v4  ;;  %v7925_v4 = vld [vmem:[%s8148_s29 + $0xb38] sm:$0xff] }
 0x14f   : > { %5064 = vmatpush.bf16.msrb.mxu1 %v7863_v5  ;;  %v7933_v5 = vld [vmem:[%s8148_s29 + $0xb78] sm:$0xff] }
 0x150   : > { %5077 = vmatpush.bf16.msrb.mxu2 %v7871_v7  ;;  %v327_v7 = vld.sshfl [vmem:[#allocation1 + $0x10] sm:$0xff pattern:$0x73625140] }
 0x151   : > { %5090 = vmatpush.bf16.msrb.mxu3 %v7879_v8  ;;  %v326_v8 = vld.sshfl [vmem:[#allocation1 + $0x8] sm:$0xff pattern:$0x73625140] }
 0x152   : > { %5052 = vmatpush.bf16.msrb.mxu0 %v7854_v11  ;;  %v4846_v35 = vpop.f32.mrf.mxu0  ;;  %v7949_v11 = vld [vmem:[%s8148_s29 + $0xbf8] sm:$0xff] }
 0x153   : > { %5065 = vmatpush.bf16.msrb.mxu1 %v7862_v12  ;;  %v4847_v36 = vadd.f32 %v4846_v35, %v8529_v62  ;;  %v4859_v39 = vpop.f32.mrf.mxu1  ;;  %v457_v12 = vpack.c.bf16 %v325_v6, %v325_v6  ;;  %v7945_v35 = vld [vmem:[%s8148_s29 + $0xbd8] sm:$0xff]  ;;  %v7964_v6 = vld [vmem:[%s8148_s29 + $0xc70] sm:$0xff] }
 0x154   : > { %5078 = vmatpush.bf16.msrb.mxu2 %v7870_v13  ;;  %v459_v13 = vpack.c.bf16 %v327_v7, %v327_v7  ;;  %v7972_v7 = vld [vmem:[%s8148_s29 + $0xcb0] sm:$0xff] }
 0x155   : > { %5091 = vmatpush.bf16.msrb.mxu3 %v7878_v14  ;;  %5053 = vmatmul.bf16.vlgmr.msrb.gmra.mxu0 %v453_v23  ;;  %v4860_v42 = vadd.f32 %v4859_v39, %v4847_v36  ;;  %v458_v14 = vpack.c.bf16 %v326_v8, %v326_v8  ;;  %v7947_v23 = vld [vmem:[%s8148_s29 + $0xbe8] sm:$0xff]  ;;  %v7980_v8 = vld [vmem:[%s8148_s29 + $0xcf0] sm:$0xff] }
 0x156   : > { %5097 = vmatpush.bf16.msra.mxu0 %v7893_v15  ;;  %5066 = vmatmul.bf16.vlgmr.msrb.gmra.mxu1 %v454_v25  ;;  %v460_v15 = vpack.c.bf16 %v328_v9, %v328_v9  ;;  %v7955_v9 = vld [vmem:[%s8148_s29 + $0xc28] sm:$0xff] }
 0x157   : > { %5110 = vmatpush.bf16.msra.mxu1 %v7901_v16  ;;  %5079 = vmatmul.bf16.vlgmr.msrb.gmra.mxu2 %v455_v24  ;;  %v7924_v16 = vld [vmem:[%s8148_s29 + $0xb30] sm:$0xff] }
 0x158   : > { %5123 = vmatpush.bf16.msra.mxu2 %v7909_v21  ;;  %5092 = vmatmul.bf16.vlgmr.msrb.gmra.mxu3 %v456_v26  ;;  %v7931_v21 = vld [vmem:[%s8148_s29 + $0xb68] sm:$0xff]  ;;  %v7922_v26 = vld [vmem:[%s8148_s29 + $0xb20] sm:$0xff] }
 0x159   : > { %5136 = vmatpush.bf16.msra.mxu3 %v7917_v22  ;;  %v7939_v22 = vld [vmem:[%s8148_s29 + $0xba8] sm:$0xff] }
 0x15a   : > { %5098 = vmatpush.bf16.msra.mxu0 %v7892_v27  ;;  %v4872_v47 = vpop.f32.mrf.mxu2  ;;  %v4848_v50 = vpop.f32.mrf.mxu0  ;;  %v7930_v27 = vld [vmem:[%s8148_s29 + $0xb60] sm:$0xff] }
 0x15b   : > { %5111 = vmatpush.bf16.msra.mxu1 %v7900_v28  ;;  %v4873_v48 = vadd.f32 %v4872_v47, %v4860_v42  ;;  %v4885_v49 = vpop.f32.mrf.mxu3  ;;  %v4861_v54 = vpop.f32.mrf.mxu1  ;;  %v7928_v42 = vld [vmem:[%s8148_s29 + $0xb50] sm:$0xff]  ;;  %v7927_v47 = vld [vmem:[%s8148_s29 + $0xb48] sm:$0xff] }
 0x15c   : > { %5124 = vmatpush.bf16.msra.mxu2 %v7908_v29  ;;  %v7938_v29 = vld [vmem:[%s8148_s29 + $0xba0] sm:$0xff]  ;;  %v7943_v50 = vld [vmem:[%s8148_s29 + $0xbc8] sm:$0xff] }
 0x15d   : > { %5137 = vmatpush.bf16.msra.mxu3 %v7916_v30  ;;  %v8565_v51 = vadd.f32 %v4885_v49, %v4873_v48  ;;  %v7946_v30 = vld [vmem:[%s8148_s29 + $0xbe0] sm:$0xff]  ;;  %v7935_v49 = vld [vmem:[%s8148_s29 + $0xb88] sm:$0xff] }
 0x15e   : > { %5099 = vmatpush.bf16.msra.mxu0 %v7891_v31  ;;  %v252_v48 = vld [vmem:[%s8143_s25 + $0x60] sm:$0xff] }
 0x15f   : > { %5112 = vmatpush.bf16.msra.mxu1 %v7899_v32  ;;  %v7921_v32 = vld [vmem:[%s8148_s29 + $0xb18] sm:$0xff]  ;;  %333 = vst [vmem:[#allocation1] ss:$4 sm:$0xff] %v252_v48  ;;  %v7926_v54 = vld [vmem:[%s8148_s29 + $0xb40] sm:$0xff] }
 0x160   : > { %5125 = vmatpush.bf16.msra.mxu2 %v7907_v33  ;;  %v7929_v33 = vld [vmem:[%s8148_s29 + $0xb58] sm:$0xff] }
 0x161   : > { %5138 = vmatpush.bf16.msra.mxu3 %v7915_v34  ;;  %v7937_v34 = vld [vmem:[%s8148_s29 + $0xb98] sm:$0xff] }
 0x162   : > { %5100 = vmatpush.bf16.msra.mxu0 %v7890_v37  ;;  %v4874_v62 = vpop.f32.mrf.mxu2 }
 0x163   : > { %5113 = vmatpush.bf16.msra.mxu1 %v7898_v38  ;;  %v4887_v63 = vpop.f32.mrf.mxu3  ;;  %v332_v62 = vld.sshfl [vmem:[#allocation1 + $0x38] sm:$0xff pattern:$0x73625140] }
 0x164   : > { %5126 = vmatpush.bf16.msra.mxu2 %v7906_v40  ;;  %v7973_v63 = vld [vmem:[%s8148_s29 + $0xcb8] sm:$0xff] }
 0x165   : > { %5139 = vmatpush.bf16.msra.mxu3 %v7914_v41  ;;  %v7920_v41 = vld [vmem:[%s8148_s29 + $0xb10] sm:$0xff] }
 0x166   : > { %5101 = vmatpush.bf16.msra.mxu0 %v7889_v43  ;;  %v335_v48 = vld.sshfl [vmem:[#allocation1] sm:$0xff pattern:$0x73625140] }
 0x167   : > { %5114 = vmatpush.bf16.msra.mxu1 %v7897_v44  ;;  %v7936_v44 = vld [vmem:[%s8148_s29 + $0xb90] sm:$0xff] }
 0x168   : > { %5127 = vmatpush.bf16.msra.mxu2 %v7905_v45  ;;  %v7944_v45 = vld [vmem:[%s8148_s29 + $0xbd0] sm:$0xff] }
 0x169   : > { %5140 = vmatpush.bf16.msra.mxu3 %v7913_v46  ;;  %v7919_v46 = vld [vmem:[%s8148_s29 + $0xb08] sm:$0xff] }
 0x16a   : > { %5102 = vmatpush.bf16.msra.mxu0 %v7888_v52 }
 0x16b   : > { %5115 = vmatpush.bf16.msra.mxu1 %v7896_v53  ;;  %v7918_v53 = vld [vmem:[%s8148_s29 + $0xb00] sm:$0xff] }
 0x16c   : > { %5128 = vmatpush.bf16.msra.mxu2 %v7904_v55  ;;  %v7934_v55 = vld [vmem:[%s8148_s29 + $0xb80] sm:$0xff] }
 0x16d   : > { %5141 = vmatpush.bf16.msra.mxu3 %v7912_v56  ;;  %v7942_v56 = vld [vmem:[%s8148_s29 + $0xbc0] sm:$0xff] }
 0x16e   : > { %5103 = vmatpush.bf16.msra.mxu0 %v7887_v57  ;;  %v7957_v57 = vld [vmem:[%s8148_s29 + $0xc38] sm:$0xff] }
 0x16f   : > { %5116 = vmatpush.bf16.msra.mxu1 %v7895_v58  ;;  %v7965_v58 = vld [vmem:[%s8148_s29 + $0xc78] sm:$0xff] }
 0x170   : > { %5129 = vmatpush.bf16.msra.mxu2 %v7903_v60  ;;  %v331_v60 = vld.sshfl [vmem:[#allocation1 + $0x30] sm:$0xff pattern:$0x73625140] }
 0x171   : > { %5142 = vmatpush.bf16.msra.mxu3 %v7911_v61  ;;  %v330_v61 = vld.sshfl [vmem:[#allocation1 + $0x28] sm:$0xff pattern:$0x73625140] }
 0x172   : > { %5104 = vmatpush.bf16.msra.mxu0 %v7886_v0  ;;  %v4898_v24 = vpop.f32.mrf.mxu0  ;;  %v7981_v0 = vld [vmem:[%s8148_s29 + $0xcf8] sm:$0xff] }
 0x173   : > { %5117 = vmatpush.bf16.msra.mxu1 %v7894_v1  ;;  %v4899_v25 = vadd.f32 %v4898_v24, %v8565_v51  ;;  %v4911_v28 = vpop.f32.mrf.mxu1  ;;  %v461_v1 = vpack.c.bf16 %v329_v59, %v329_v59  ;;  %v7977_v24 = vld [vmem:[%s8148_s29 + $0xcd8] sm:$0xff]  ;;  %v7996_v59 = vld [vmem:[%s8148_s29 + $0xd70] sm:$0xff] }
 0x174   : > { %5130 = vmatpush.bf16.msra.mxu2 %v7902_v2  ;;  %v463_v2 = vpack.c.bf16 %v331_v60, %v331_v60  ;;  %v8004_v60 = vld [vmem:[%s8148_s29 + $0xdb0] sm:$0xff] }
 0x175   : > { %5143 = vmatpush.bf16.msra.mxu3 %v7910_v3  ;;  %5105 = vmatmul.bf16.vlgmr.msra.gmra.mxu0 %v457_v12  ;;  %v4912_v31 = vadd.f32 %v4911_v28, %v4899_v25  ;;  %v462_v3 = vpack.c.bf16 %v330_v61, %v330_v61  ;;  %v7979_v12 = vld [vmem:[%s8148_s29 + $0xce8] sm:$0xff]  ;;  %v8012_v61 = vld [vmem:[%s8148_s29 + $0xdf0] sm:$0xff] }
 0x176   : > { %5149 = vmatpush.bf16.msrb.mxu0 %v7925_v4  ;;  %5118 = vmatmul.bf16.vlgmr.msra.gmra.mxu1 %v458_v14  ;;  %v464_v4 = vpack.c.bf16 %v332_v62, %v332_v62  ;;  %v7987_v62 = vld [vmem:[%s8148_s29 + $0xd28] sm:$0xff] }
 0x177   : > { %5162 = vmatpush.bf16.msrb.mxu1 %v7933_v5  ;;  %5131 = vmatmul.bf16.vlgmr.msra.gmra.mxu2 %v459_v13  ;;  %v7956_v5 = vld [vmem:[%s8148_s29 + $0xc30] sm:$0xff] }
 0x178   : > { %5175 = vmatpush.bf16.msrb.mxu2 %v7941_v10  ;;  %5144 = vmatmul.bf16.vlgmr.msra.gmra.mxu3 %v460_v15  ;;  %v7963_v10 = vld [vmem:[%s8148_s29 + $0xc68] sm:$0xff]  ;;  %v7954_v15 = vld [vmem:[%s8148_s29 + $0xc20] sm:$0xff] }
 0x179   : > { %5188 = vmatpush.bf16.msrb.mxu3 %v7949_v11  ;;  %v7971_v11 = vld [vmem:[%s8148_s29 + $0xca8] sm:$0xff] }
 0x17a   : > { %5150 = vmatpush.bf16.msrb.mxu0 %v7924_v16  ;;  %v4924_v36 = vpop.f32.mrf.mxu2  ;;  %v4900_v39 = vpop.f32.mrf.mxu0  ;;  %v7962_v16 = vld [vmem:[%s8148_s29 + $0xc60] sm:$0xff] }
 0x17b   : > { %5163 = vmatpush.bf16.msrb.mxu1 %v7932_v17  ;;  %v4925_v37 = vadd.f32 %v4924_v36, %v4912_v31  ;;  %v4937_v38 = vpop.f32.mrf.mxu3  ;;  %v4913_v43 = vpop.f32.mrf.mxu1  ;;  %v7960_v31 = vld [vmem:[%s8148_s29 + $0xc50] sm:$0xff]  ;;  %v7959_v36 = vld [vmem:[%s8148_s29 + $0xc48] sm:$0xff] }
 0x17c   : > { %5176 = vmatpush.bf16.msrb.mxu2 %v7940_v18  ;;  %v7970_v18 = vld [vmem:[%s8148_s29 + $0xca0] sm:$0xff]  ;;  %v7975_v39 = vld [vmem:[%s8148_s29 + $0xcc8] sm:$0xff] }
 0x17d   : > { %5189 = vmatpush.bf16.msrb.mxu3 %v7948_v19  ;;  %v8601_v40 = vadd.f32 %v4937_v38, %v4925_v37  ;;  %v7978_v19 = vld [vmem:[%s8148_s29 + $0xce0] sm:$0xff]  ;;  %v253_v37 = vld [vmem:[%s8143_s25 + $0x68] sm:$0xff] }
 0x17e   : > { %5151 = vmatpush.bf16.msrb.mxu0 %v7923_v20  ;;  %v7967_v38 = vld [vmem:[%s8148_s29 + $0xc88] sm:$0xff]  ;;  %334 = vst [vmem:[#allocation1 + $0x20] ss:$4 sm:$0xff] %v253_v37  ;;  %v7958_v43 = vld [vmem:[%s8148_s29 + $0xc40] sm:$0xff] }
 0x17f   : > { %5164 = vmatpush.bf16.msrb.mxu1 %v7931_v21  ;;  %v7953_v21 = vld [vmem:[%s8148_s29 + $0xc18] sm:$0xff] }
 0x180   : > { %5177 = vmatpush.bf16.msrb.mxu2 %v7939_v22  ;;  %v7961_v22 = vld [vmem:[%s8148_s29 + $0xc58] sm:$0xff] }
 0x181   : > { %5190 = vmatpush.bf16.msrb.mxu3 %v7947_v23  ;;  %v7969_v23 = vld [vmem:[%s8148_s29 + $0xc98] sm:$0xff] }
 0x182   : > { %5152 = vmatpush.bf16.msrb.mxu0 %v7922_v26  ;;  %v4926_v51 = vpop.f32.mrf.mxu2 }
 0x183   : > { %5165 = vmatpush.bf16.msrb.mxu1 %v7930_v27  ;;  %v4939_v52 = vpop.f32.mrf.mxu3  ;;  %v338_v51 = vld.sshfl [vmem:[#allocation1 + $0x18] sm:$0xff pattern:$0x73625140] }
 0x184   : > { %5178 = vmatpush.bf16.msrb.mxu2 %v7938_v29  ;;  %v8005_v52 = vld [vmem:[%s8148_s29 + $0xdb8] sm:$0xff] }
 0x185   : > { %5191 = vmatpush.bf16.msrb.mxu3 %v7946_v30  ;;  %v7952_v30 = vld [vmem:[%s8148_s29 + $0xc10] sm:$0xff]  ;;  %v339_v37 = vld.sshfl [vmem:[#allocation1 + $0x20] sm:$0xff pattern:$0x73625140] }
 0x186   : > { %5153 = vmatpush.bf16.msrb.mxu0 %v7921_v32 }
 0x187   : > { %5166 = vmatpush.bf16.msrb.mxu1 %v7929_v33  ;;  %v7968_v33 = vld [vmem:[%s8148_s29 + $0xc90] sm:$0xff] }
 0x188   : > { %5179 = vmatpush.bf16.msrb.mxu2 %v7937_v34  ;;  %v7976_v34 = vld [vmem:[%s8148_s29 + $0xcd0] sm:$0xff] }
 0x189   : > { %5192 = vmatpush.bf16.msrb.mxu3 %v7945_v35  ;;  %v7951_v35 = vld [vmem:[%s8148_s29 + $0xc08] sm:$0xff] }
 0x18a   : > { %5154 = vmatpush.bf16.msrb.mxu0 %v7920_v41 }
 0x18b   : > { %5167 = vmatpush.bf16.msrb.mxu1 %v7928_v42  ;;  %v7950_v42 = vld [vmem:[%s8148_s29 + $0xc00] sm:$0xff] }
 0x18c   : > { %5180 = vmatpush.bf16.msrb.mxu2 %v7936_v44  ;;  %v7966_v44 = vld [vmem:[%s8148_s29 + $0xc80] sm:$0xff] }
 0x18d   : > { %5193 = vmatpush.bf16.msrb.mxu3 %v7944_v45  ;;  %v7974_v45 = vld [vmem:[%s8148_s29 + $0xcc0] sm:$0xff] }
 0x18e   : > { %5155 = vmatpush.bf16.msrb.mxu0 %v7919_v46  ;;  %v7989_v46 = vld [vmem:[%s8148_s29 + $0xd38] sm:$0xff] }
 0x18f   : > { %5168 = vmatpush.bf16.msrb.mxu1 %v7927_v47  ;;  %v7997_v47 = vld [vmem:[%s8148_s29 + $0xd78] sm:$0xff] }
 0x190   : > { %5181 = vmatpush.bf16.msrb.mxu2 %v7935_v49  ;;  %v337_v49 = vld.sshfl [vmem:[#allocation1 + $0x10] sm:$0xff pattern:$0x73625140] }
 0x191   : > { %5194 = vmatpush.bf16.msrb.mxu3 %v7943_v50  ;;  %v336_v50 = vld.sshfl [vmem:[#allocation1 + $0x8] sm:$0xff pattern:$0x73625140] }
 0x192   : > { %5156 = vmatpush.bf16.msrb.mxu0 %v7918_v53  ;;  %v4950_v13 = vpop.f32.mrf.mxu0  ;;  %v8013_v53 = vld [vmem:[%s8148_s29 + $0xdf8] sm:$0xff] }
 0x193   : > { %5169 = vmatpush.bf16.msrb.mxu1 %v7926_v54  ;;  %v4951_v14 = vadd.f32 %v4950_v13, %v8601_v40  ;;  %v4963_v17 = vpop.f32.mrf.mxu1  ;;  %v465_v54 = vpack.c.bf16 %v335_v48, %v335_v48  ;;  %v8009_v13 = vld [vmem:[%s8148_s29 + $0xdd8] sm:$0xff]  ;;  %v8028_v48 = vld [vmem:[%s8148_s29 + $0xe70] sm:$0xff] }
 0x194   : > { %5182 = vmatpush.bf16.msrb.mxu2 %v7934_v55  ;;  %v467_v55 = vpack.c.bf16 %v337_v49, %v337_v49  ;;  %v8036_v49 = vld [vmem:[%s8148_s29 + $0xeb0] sm:$0xff] }
 0x195   : > { %5195 = vmatpush.bf16.msrb.mxu3 %v7942_v56  ;;  %5157 = vmatmul.bf16.vlgmr.msrb.gmra.mxu0 %v461_v1  ;;  %v4964_v20 = vadd.f32 %v4963_v17, %v4951_v14  ;;  %v466_v56 = vpack.c.bf16 %v336_v50, %v336_v50  ;;  %v8011_v1 = vld [vmem:[%s8148_s29 + $0xde8] sm:$0xff]  ;;  %v8044_v50 = vld [vmem:[%s8148_s29 + $0xef0] sm:$0xff] }
 0x196   : > { %5201 = vmatpush.bf16.msra.mxu0 %v7957_v57  ;;  %5170 = vmatmul.bf16.vlgmr.msrb.gmra.mxu1 %v462_v3  ;;  %v468_v57 = vpack.c.bf16 %v338_v51, %v338_v51  ;;  %v8019_v51 = vld [vmem:[%s8148_s29 + $0xe28] sm:$0xff] }
 0x197   : > { %5214 = vmatpush.bf16.msra.mxu1 %v7965_v58  ;;  %5183 = vmatmul.bf16.vlgmr.msrb.gmra.mxu2 %v463_v2  ;;  %v7988_v58 = vld [vmem:[%s8148_s29 + $0xd30] sm:$0xff] }
 0x198   : > { %5227 = vmatpush.bf16.msra.mxu2 %v7973_v63  ;;  %5196 = vmatmul.bf16.vlgmr.msrb.gmra.mxu3 %v464_v4  ;;  %v7995_v63 = vld [vmem:[%s8148_s29 + $0xd68] sm:$0xff]  ;;  %v7986_v4 = vld [vmem:[%s8148_s29 + $0xd20] sm:$0xff] }
 0x199   : > { %5240 = vmatpush.bf16.msra.mxu3 %v7981_v0  ;;  %v8003_v0 = vld [vmem:[%s8148_s29 + $0xda8] sm:$0xff] }
 0x19a   : > { %5202 = vmatpush.bf16.msra.mxu0 %v7956_v5  ;;  %v4976_v25 = vpop.f32.mrf.mxu2  ;;  %v4952_v28 = vpop.f32.mrf.mxu0  ;;  %v7994_v5 = vld [vmem:[%s8148_s29 + $0xd60] sm:$0xff] }
 0x19b   : > { %5215 = vmatpush.bf16.msra.mxu1 %v7964_v6  ;;  %v4977_v26 = vadd.f32 %v4976_v25, %v4964_v20  ;;  %v4989_v27 = vpop.f32.mrf.mxu3  ;;  %v4965_v32 = vpop.f32.mrf.mxu1  ;;  %v7992_v20 = vld [vmem:[%s8148_s29 + $0xd50] sm:$0xff]  ;;  %v7991_v25 = vld [vmem:[%s8148_s29 + $0xd48] sm:$0xff] }
 0x19c   : > { %5228 = vmatpush.bf16.msra.mxu2 %v7972_v7  ;;  %v8002_v7 = vld [vmem:[%s8148_s29 + $0xda0] sm:$0xff]  ;;  %v8007_v28 = vld [vmem:[%s8148_s29 + $0xdc8] sm:$0xff] }
 0x19d   : > { %5241 = vmatpush.bf16.msra.mxu3 %v7980_v8  ;;  %v8637_v29 = vadd.f32 %v4989_v27, %v4977_v26  ;;  %v8010_v8 = vld [vmem:[%s8148_s29 + $0xde0] sm:$0xff]  ;;  %v254_v26 = vld [vmem:[%s8143_s25 + $0x70] sm:$0xff]  ;;  %v7999_v27 = vld [vmem:[%s8148_s29 + $0xd88] sm:$0xff] }
 0x19e   : > { %5203 = vmatpush.bf16.msra.mxu0 %v7955_v9  ;;  %343 = vst [vmem:[#allocation1] ss:$4 sm:$0xff] %v254_v26  ;;  %v7990_v32 = vld [vmem:[%s8148_s29 + $0xd40] sm:$0xff] }
 0x19f   : > { %5216 = vmatpush.bf16.msra.mxu1 %v7963_v10  ;;  %v7985_v10 = vld [vmem:[%s8148_s29 + $0xd18] sm:$0xff] }
 0x1a0   : > { %5229 = vmatpush.bf16.msra.mxu2 %v7971_v11  ;;  %v7993_v11 = vld [vmem:[%s8148_s29 + $0xd58] sm:$0xff] }
 0x1a1   : > { %5242 = vmatpush.bf16.msra.mxu3 %v7979_v12  ;;  %v8001_v12 = vld [vmem:[%s8148_s29 + $0xd98] sm:$0xff] }
 0x1a2   : > { %5204 = vmatpush.bf16.msra.mxu0 %v7954_v15  ;;  %v4978_v40 = vpop.f32.mrf.mxu2 }
 0x1a3   : > { %5217 = vmatpush.bf16.msra.mxu1 %v7962_v16  ;;  %v4991_v41 = vpop.f32.mrf.mxu3  ;;  %v342_v40 = vld.sshfl [vmem:[#allocation1 + $0x38] sm:$0xff pattern:$0x73625140] }
 0x1a4   : > { %5230 = vmatpush.bf16.msra.mxu2 %v7970_v18  ;;  %v8037_v41 = vld [vmem:[%s8148_s29 + $0xeb8] sm:$0xff] }
 0x1a5   : > { %5243 = vmatpush.bf16.msra.mxu3 %v7978_v19  ;;  %v7984_v19 = vld [vmem:[%s8148_s29 + $0xd10] sm:$0xff]  ;;  %v345_v26 = vld.sshfl [vmem:[#allocation1] sm:$0xff pattern:$0x73625140] }
 0x1a6   : > { %5205 = vmatpush.bf16.msra.mxu0 %v7953_v21 }
 0x1a7   : > { %5218 = vmatpush.bf16.msra.mxu1 %v7961_v22  ;;  %v8000_v22 = vld [vmem:[%s8148_s29 + $0xd90] sm:$0xff] }
 0x1a8   : > { %5231 = vmatpush.bf16.msra.mxu2 %v7969_v23  ;;  %v8008_v23 = vld [vmem:[%s8148_s29 + $0xdd0] sm:$0xff] }
 0x1a9   : > { %5244 = vmatpush.bf16.msra.mxu3 %v7977_v24  ;;  %v7983_v24 = vld [vmem:[%s8148_s29 + $0xd08] sm:$0xff] }
 0x1aa   : > { %5206 = vmatpush.bf16.msra.mxu0 %v7952_v30 }
 0x1ab   : > { %5219 = vmatpush.bf16.msra.mxu1 %v7960_v31  ;;  %v7982_v31 = vld [vmem:[%s8148_s29 + $0xd00] sm:$0xff] }
 0x1ac   : > { %5232 = vmatpush.bf16.msra.mxu2 %v7968_v33  ;;  %v7998_v33 = vld [vmem:[%s8148_s29 + $0xd80] sm:$0xff] }
 0x1ad   : > { %5245 = vmatpush.bf16.msra.mxu3 %v7976_v34  ;;  %v8006_v34 = vld [vmem:[%s8148_s29 + $0xdc0] sm:$0xff] }
 0x1ae   : > { %5207 = vmatpush.bf16.msra.mxu0 %v7951_v35  ;;  %v8021_v35 = vld [vmem:[%s8148_s29 + $0xe38] sm:$0xff] }
 0x1af   : > { %5220 = vmatpush.bf16.msra.mxu1 %v7959_v36  ;;  %v8029_v36 = vld [vmem:[%s8148_s29 + $0xe78] sm:$0xff] }
 0x1b0   : > { %5233 = vmatpush.bf16.msra.mxu2 %v7967_v38  ;;  %v341_v38 = vld.sshfl [vmem:[#allocation1 + $0x30] sm:$0xff pattern:$0x73625140] }
 0x1b1   : > { %5246 = vmatpush.bf16.msra.mxu3 %v7975_v39  ;;  %v340_v39 = vld.sshfl [vmem:[#allocation1 + $0x28] sm:$0xff pattern:$0x73625140] }
 0x1b2   : > { %5208 = vmatpush.bf16.msra.mxu0 %v7950_v42  ;;  %v5002_v2 = vpop.f32.mrf.mxu0  ;;  %v8045_v42 = vld [vmem:[%s8148_s29 + $0xef8] sm:$0xff] }
 0x1b3   : > { %5221 = vmatpush.bf16.msra.mxu1 %v7958_v43  ;;  %v5003_v3 = vadd.f32 %v5002_v2, %v8637_v29  ;;  %v5015_v6 = vpop.f32.mrf.mxu1  ;;  %v469_v43 = vpack.c.bf16 %v339_v37, %v339_v37  ;;  %v8041_v2 = vld [vmem:[%s8148_s29 + $0xed8] sm:$0xff]  ;;  %v8060_v37 = vld [vmem:[%s8148_s29 + $0xf70] sm:$0xff] }
 0x1b4   : > { %5234 = vmatpush.bf16.msra.mxu2 %v7966_v44  ;;  %v471_v44 = vpack.c.bf16 %v341_v38, %v341_v38  ;;  %v8068_v38 = vld [vmem:[%s8148_s29 + $0xfb0] sm:$0xff] }
 0x1b5   : > { %5247 = vmatpush.bf16.msra.mxu3 %v7974_v45  ;;  %5209 = vmatmul.bf16.vlgmr.msra.gmra.mxu0 %v465_v54  ;;  %v5016_v9 = vadd.f32 %v5015_v6, %v5003_v3  ;;  %v470_v45 = vpack.c.bf16 %v340_v39, %v340_v39  ;;  %v8043_v54 = vld [vmem:[%s8148_s29 + $0xee8] sm:$0xff]  ;;  %v8076_v39 = vld [vmem:[%s8148_s29 + $0xff0] sm:$0xff] }
 0x1b6   : > { %5253 = vmatpush.bf16.msrb.mxu0 %v7989_v46  ;;  %5222 = vmatmul.bf16.vlgmr.msra.gmra.mxu1 %v466_v56  ;;  %v472_v46 = vpack.c.bf16 %v342_v40, %v342_v40  ;;  %v8051_v40 = vld [vmem:[%s8148_s29 + $0xf28] sm:$0xff] }
 0x1b7   : > { %5266 = vmatpush.bf16.msrb.mxu1 %v7997_v47  ;;  %5235 = vmatmul.bf16.vlgmr.msra.gmra.mxu2 %v467_v55  ;;  %v8020_v47 = vld [vmem:[%s8148_s29 + $0xe30] sm:$0xff] }
 0x1b8   : > { %5279 = vmatpush.bf16.msrb.mxu2 %v8005_v52  ;;  %5248 = vmatmul.bf16.vlgmr.msra.gmra.mxu3 %v468_v57  ;;  %v8027_v52 = vld [vmem:[%s8148_s29 + $0xe68] sm:$0xff]  ;;  %v8018_v57 = vld [vmem:[%s8148_s29 + $0xe20] sm:$0xff] }
 0x1b9   : > { %5292 = vmatpush.bf16.msrb.mxu3 %v8013_v53  ;;  %v8035_v53 = vld [vmem:[%s8148_s29 + $0xea8] sm:$0xff] }
 0x1ba   : > { %5254 = vmatpush.bf16.msrb.mxu0 %v7988_v58  ;;  %v5028_v14 = vpop.f32.mrf.mxu2  ;;  %v5004_v17 = vpop.f32.mrf.mxu0  ;;  %v8026_v58 = vld [vmem:[%s8148_s29 + $0xe60] sm:$0xff] }
 0x1bb   : > { %5267 = vmatpush.bf16.msrb.mxu1 %v7996_v59  ;;  %v5029_v15 = vadd.f32 %v5028_v14, %v5016_v9  ;;  %v5041_v16 = vpop.f32.mrf.mxu3  ;;  %v5017_v21 = vpop.f32.mrf.mxu1  ;;  %v8024_v9 = vld [vmem:[%s8148_s29 + $0xe50] sm:$0xff]  ;;  %v8015_v14 = vld [vmem:[%s8148_s29 + $0xe08] sm:$0xff] }
 0x1bc   : > { %5280 = vmatpush.bf16.msrb.mxu2 %v8004_v60  ;;  %v8034_v60 = vld [vmem:[%s8148_s29 + $0xea0] sm:$0xff]  ;;  %v8039_v17 = vld [vmem:[%s8148_s29 + $0xec8] sm:$0xff] }
 0x1bd   : > { %5293 = vmatpush.bf16.msrb.mxu3 %v8012_v61  ;;  %v8673_v18 = vadd.f32 %v5041_v16, %v5029_v15  ;;  %v8042_v61 = vld [vmem:[%s8148_s29 + $0xee0] sm:$0xff]  ;;  %v8023_v15 = vld [vmem:[%s8148_s29 + $0xe48] sm:$0xff] }
 0x1be   : > { %5255 = vmatpush.bf16.msrb.mxu0 %v7987_v62  ;;  %v8031_v16 = vld [vmem:[%s8148_s29 + $0xe88] sm:$0xff]  ;;  %v8022_v21 = vld [vmem:[%s8148_s29 + $0xe40] sm:$0xff] }
 0x1bf   : > { %5268 = vmatpush.bf16.msrb.mxu1 %v7995_v63  ;;  %v8017_v63 = vld [vmem:[%s8148_s29 + $0xe18] sm:$0xff] }
 0x1c0   : > { %5281 = vmatpush.bf16.msrb.mxu2 %v8003_v0  ;;  %v8025_v0 = vld [vmem:[%s8148_s29 + $0xe58] sm:$0xff] }
 0x1c1   : > { %5294 = vmatpush.bf16.msrb.mxu3 %v8011_v1  ;;  %v8033_v1 = vld [vmem:[%s8148_s29 + $0xe98] sm:$0xff] }
 0x1c2   : > { %5256 = vmatpush.bf16.msrb.mxu0 %v7986_v4  ;;  %v5030_v29 = vpop.f32.mrf.mxu2 }
 0x1c3   : > { %5269 = vmatpush.bf16.msrb.mxu1 %v7994_v5  ;;  %v5043_v30 = vpop.f32.mrf.mxu3  ;;  %v348_v29 = vld.sshfl [vmem:[#allocation1 + $0x18] sm:$0xff pattern:$0x73625140] }
 0x1c4   : > { %5282 = vmatpush.bf16.msrb.mxu2 %v8002_v7  ;;  %v8069_v30 = vld [vmem:[%s8148_s29 + $0xfb8] sm:$0xff] }
 0x1c5   : > { %5295 = vmatpush.bf16.msrb.mxu3 %v8010_v8  ;;  %v8016_v8 = vld [vmem:[%s8148_s29 + $0xe10] sm:$0xff] }
 0x1c6   : > { %5257 = vmatpush.bf16.msrb.mxu0 %v7985_v10 }
 0x1c7   : > { %5270 = vmatpush.bf16.msrb.mxu1 %v7993_v11  ;;  %v8032_v11 = vld [vmem:[%s8148_s29 + $0xe90] sm:$0xff] }
 0x1c8   : > { %5283 = vmatpush.bf16.msrb.mxu2 %v8001_v12  ;;  %v8040_v12 = vld [vmem:[%s8148_s29 + $0xed0] sm:$0xff] }
 0x1c9   : > { %5296 = vmatpush.bf16.msrb.mxu3 %v8009_v13  ;;  %v255_v13 = vld [vmem:[%s8143_s25 + $0x78] sm:$0xff] }
 0x1ca   : > { %5258 = vmatpush.bf16.msrb.mxu0 %v7984_v19  ;;  %344 = vst [vmem:[#allocation1 + $0x20] ss:$4 sm:$0xff] %v255_v13 }
 0x1cb   : > { %5271 = vmatpush.bf16.msrb.mxu1 %v7992_v20  ;;  %v8014_v20 = vld [vmem:[%s8148_s29 + $0xe00] sm:$0xff] }
 0x1cc   : > { %5284 = vmatpush.bf16.msrb.mxu2 %v8000_v22  ;;  %v8030_v22 = vld [vmem:[%s8148_s29 + $0xe80] sm:$0xff] }
 0x1cd   : > { %5297 = vmatpush.bf16.msrb.mxu3 %v8008_v23  ;;  %v8038_v23 = vld [vmem:[%s8148_s29 + $0xec0] sm:$0xff] }
 0x1ce   : > { %5259 = vmatpush.bf16.msrb.mxu0 %v7983_v24  ;;  %v8053_v24 = vld [vmem:[%s8148_s29 + $0xf38] sm:$0xff] }
 0x1cf   : > { %5272 = vmatpush.bf16.msrb.mxu1 %v7991_v25  ;;  %v8061_v25 = vld [vmem:[%s8148_s29 + $0xf78] sm:$0xff] }
 0x1d0   : > { %5285 = vmatpush.bf16.msrb.mxu2 %v7999_v27  ;;  %v347_v27 = vld.sshfl [vmem:[#allocation1 + $0x10] sm:$0xff pattern:$0x73625140] }
 0x1d1   : > { %5298 = vmatpush.bf16.msrb.mxu3 %v8007_v28  ;;  %v346_v28 = vld.sshfl [vmem:[#allocation1 + $0x8] sm:$0xff pattern:$0x73625140] }
 0x1d2   : > { %5260 = vmatpush.bf16.msrb.mxu0 %v7982_v31  ;;  %v5054_v55 = vpop.f32.mrf.mxu0  ;;  %v8077_v31 = vld [vmem:[%s8148_s29 + $0xff8] sm:$0xff]  ;;  %v350_v13 = vld.sshfl [vmem:[#allocation1 + $0x28] sm:$0xff pattern:$0x73625140] }
 0x1d3   : > { %5273 = vmatpush.bf16.msrb.mxu1 %v7990_v32  ;;  %v5055_v56 = vadd.f32 %v5054_v55, %v8673_v18  ;;  %v5067_v59 = vpop.f32.mrf.mxu1  ;;  %v473_v32 = vpack.c.bf16 %v345_v26, %v345_v26  ;;  %v8073_v55 = vld [vmem:[%s8148_s29 + $0xfd8] sm:$0xff] }
 0x1d4   : > { %5286 = vmatpush.bf16.msrb.mxu2 %v7998_v33  ;;  %v475_v33 = vpack.c.bf16 %v347_v27, %v347_v27 }
 0x1d5   : > { %5299 = vmatpush.bf16.msrb.mxu3 %v8006_v34  ;;  %5261 = vmatmul.bf16.vlgmr.msrb.gmra.mxu0 %v469_v43  ;;  %v5068_v62 = vadd.f32 %v5067_v59, %v5055_v56  ;;  %v474_v34 = vpack.c.bf16 %v346_v28, %v346_v28  ;;  %v8075_v43 = vld [vmem:[%s8148_s29 + $0xfe8] sm:$0xff] }
 0x1d6   : > { %5305 = vmatpush.bf16.msra.mxu0 %v8021_v35  ;;  %5274 = vmatmul.bf16.vlgmr.msrb.gmra.mxu1 %v470_v45  ;;  %v476_v35 = vpack.c.bf16 %v348_v29, %v348_v29 }
 0x1d7   : > { %5318 = vmatpush.bf16.msra.mxu1 %v8029_v36  ;;  %5287 = vmatmul.bf16.vlgmr.msrb.gmra.mxu2 %v471_v44  ;;  %v8052_v36 = vld [vmem:[%s8148_s29 + $0xf30] sm:$0xff] }
 0x1d8   : > { %5331 = vmatpush.bf16.msra.mxu2 %v8037_v41  ;;  %5300 = vmatmul.bf16.vlgmr.msrb.gmra.mxu3 %v472_v46  ;;  %v8059_v41 = vld [vmem:[%s8148_s29 + $0xf68] sm:$0xff]  ;;  %v8050_v46 = vld [vmem:[%s8148_s29 + $0xf20] sm:$0xff] }
 0x1d9   : > { %5344 = vmatpush.bf16.msra.mxu3 %v8045_v42  ;;  %v8067_v42 = vld [vmem:[%s8148_s29 + $0xfa8] sm:$0xff] }
 0x1da   : > { %5306 = vmatpush.bf16.msra.mxu0 %v8020_v47  ;;  %v5080_v3 = vpop.f32.mrf.mxu2  ;;  %v5056_v6 = vpop.f32.mrf.mxu0  ;;  %v8058_v47 = vld [vmem:[%s8148_s29 + $0xf60] sm:$0xff] }
 0x1db   : > { %5319 = vmatpush.bf16.msra.mxu1 %v8028_v48  ;;  %v5081_v4 = vadd.f32 %v5080_v3, %v5068_v62  ;;  %v5093_v5 = vpop.f32.mrf.mxu3  ;;  %v5069_v10 = vpop.f32.mrf.mxu1  ;;  %v8056_v62 = vld [vmem:[%s8148_s29 + $0xf50] sm:$0xff]  ;;  %v8055_v3 = vld [vmem:[%s8148_s29 + $0xf48] sm:$0xff] }
 0x1dc   : > { %5332 = vmatpush.bf16.msra.mxu2 %v8036_v49  ;;  %v8066_v49 = vld [vmem:[%s8148_s29 + $0xfa0] sm:$0xff] }
 0x1dd   : > { %5345 = vmatpush.bf16.msra.mxu3 %v8044_v50  ;;  %v8709_v7 = vadd.f32 %v5093_v5, %v5081_v4  ;;  %v8074_v50 = vld [vmem:[%s8148_s29 + $0xfe0] sm:$0xff]  ;;  %v8063_v4 = vld [vmem:[%s8148_s29 + $0xf88] sm:$0xff] }
 0x1de   : > { %5307 = vmatpush.bf16.msra.mxu0 %v8019_v51  ;;  %v8071_v5 = vld [vmem:[%s8148_s29 + $0xfc8] sm:$0xff]  ;;  %v8062_v10 = vld [vmem:[%s8148_s29 + $0xf80] sm:$0xff] }
 0x1df   : > { %5320 = vmatpush.bf16.msra.mxu1 %v8027_v52  ;;  %v8049_v52 = vld [vmem:[%s8148_s29 + $0xf18] sm:$0xff] }
 0x1e0   : > { %5333 = vmatpush.bf16.msra.mxu2 %v8035_v53  ;;  %v8057_v53 = vld [vmem:[%s8148_s29 + $0xf58] sm:$0xff] }
 0x1e1   : > { %5346 = vmatpush.bf16.msra.mxu3 %v8043_v54  ;;  %v8065_v54 = vld [vmem:[%s8148_s29 + $0xf98] sm:$0xff] }
 0x1e2   : > { %5308 = vmatpush.bf16.msra.mxu0 %v8018_v57  ;;  %v5082_v18 = vpop.f32.mrf.mxu2 }
 0x1e3   : > { %5321 = vmatpush.bf16.msra.mxu1 %v8026_v58  ;;  %v5095_v19 = vpop.f32.mrf.mxu3 }
 0x1e4   : > { %5334 = vmatpush.bf16.msra.mxu2 %v8034_v60 }
 0x1e5   : > { %5347 = vmatpush.bf16.msra.mxu3 %v8042_v61  ;;  %v8048_v61 = vld [vmem:[%s8148_s29 + $0xf10] sm:$0xff] }
 0x1e6   : > { %5309 = vmatpush.bf16.msra.mxu0 %v8017_v63 }
 0x1e7   : > { %5322 = vmatpush.bf16.msra.mxu1 %v8025_v0  ;;  %v8064_v0 = vld [vmem:[%s8148_s29 + $0xf90] sm:$0xff] }
 0x1e8   : > { %5335 = vmatpush.bf16.msra.mxu2 %v8033_v1  ;;  %v8072_v1 = vld [vmem:[%s8148_s29 + $0xfd0] sm:$0xff] }
 0x1e9   : > { %5348 = vmatpush.bf16.msra.mxu3 %v8041_v2  ;;  %v8047_v2 = vld [vmem:[%s8148_s29 + $0xf08] sm:$0xff] }
 0x1ea   : > { %5310 = vmatpush.bf16.msra.mxu0 %v8016_v8 }
 0x1eb   : > { %5323 = vmatpush.bf16.msra.mxu1 %v8024_v9  ;;  %v8054_v9 = vld [vmem:[%s8148_s29 + $0xf40] sm:$0xff] }
 0x1ec   : > { %5336 = vmatpush.bf16.msra.mxu2 %v8032_v11  ;;  %v8070_v11 = vld [vmem:[%s8148_s29 + $0xfc0] sm:$0xff] }
 0x1ed   : > { %5349 = vmatpush.bf16.msra.mxu3 %v8040_v12  ;;  %v349_v12 = vld.sshfl [vmem:[#allocation1 + $0x20] sm:$0xff pattern:$0x73625140] }
 0x1ee   : > { %5311 = vmatpush.bf16.msra.mxu0 %v8015_v14  ;;  %v351_v14 = vld.sshfl [vmem:[#allocation1 + $0x30] sm:$0xff pattern:$0x73625140] }
 0x1ef   : > { %5324 = vmatpush.bf16.msra.mxu1 %v8023_v15  ;;  %v352_v15 = vld.sshfl [vmem:[#allocation1 + $0x38] sm:$0xff pattern:$0x73625140]  ;;  %v479_v18 = vpack.c.bf16 %v351_v14, %v351_v14 }
 0x1f0   : > { %5337 = vmatpush.bf16.msra.mxu2 %v8031_v16  ;;  %v477_v16 = vpack.c.bf16 %v349_v12, %v349_v12  ;;  %v480_v19 = vpack.c.bf16 %v352_v15, %v352_v15 }
 0x1f1   : > { %5350 = vmatpush.bf16.msra.mxu3 %v8039_v17  ;;  %v478_v17 = vpack.c.bf16 %v350_v13, %v350_v13  ;;  %v239_v13 = vld [vmem:[#allocation2] sm:$0x3] }
 0x1f2   : > { %5312 = vmatpush.bf16.msra.mxu0 %v8014_v20  ;;  %v5106_v44 = vpop.f32.mrf.mxu0 }
 0x1f3   : > { %5325 = vmatpush.bf16.msra.mxu1 %v8022_v21  ;;  %v5107_v45 = vadd.f32 %v5106_v44, %v8709_v7  ;;  %v5119_v48 = vpop.f32.mrf.mxu1  ;;  %v8046_v7 = vld [vmem:[%s8148_s29 + $0xf00] sm:$0xff] }
 0x1f4   : > { %5338 = vmatpush.bf16.msra.mxu2 %v8030_v22 }
 0x1f5   : > { %5351 = vmatpush.bf16.msra.mxu3 %v8038_v23  ;;  %5313 = vmatmul.bf16.vlgmr.msra.gmra.mxu0 %v473_v32  ;;  %v5120_v51 = vadd.f32 %v5119_v48, %v5107_v45 }
 0x1f6   : > { %5357 = vmatpush.bf16.msrb.mxu0 %v8053_v24  ;;  %5326 = vmatmul.bf16.vlgmr.msra.gmra.mxu1 %v474_v34 }
 0x1f7   : > { %5370 = vmatpush.bf16.msrb.mxu1 %v8061_v25  ;;  %5339 = vmatmul.bf16.vlgmr.msra.gmra.mxu2 %v475_v33 }
 0x1f8   : > { %5383 = vmatpush.bf16.msrb.mxu2 %v8069_v30  ;;  %5352 = vmatmul.bf16.vlgmr.msra.gmra.mxu3 %v476_v35 }
 0x1f9   : > { %5396 = vmatpush.bf16.msrb.mxu3 %v8077_v31 }
 0x1fa   : > { %5358 = vmatpush.bf16.msrb.mxu0 %v8052_v36  ;;  %v5132_v56 = vpop.f32.mrf.mxu2  ;;  %v5108_v59 = vpop.f32.mrf.mxu0 }
 0x1fb   : > { %5371 = vmatpush.bf16.msrb.mxu1 %v8060_v37  ;;  %v5133_v57 = vadd.f32 %v5132_v56, %v5120_v51  ;;  %v5145_v58 = vpop.f32.mrf.mxu3  ;;  %v5121_v63 = vpop.f32.mrf.mxu1 }
 0x1fc   : > { %5384 = vmatpush.bf16.msrb.mxu2 %v8068_v38 }
 0x1fd   : > { %5397 = vmatpush.bf16.msrb.mxu3 %v8076_v39  ;;  %v5146_v60 = vadd.f32 %v5145_v58, %v5133_v57 }
 0x1fe   : > { %5359 = vmatpush.bf16.msrb.mxu0 %v8051_v40 }
 0x1ff   : > { %5372 = vmatpush.bf16.msrb.mxu1 %v8059_v41 }
 0x200   : > { %5385 = vmatpush.bf16.msrb.mxu2 %v8067_v42 }
 0x201   : > { %5398 = vmatpush.bf16.msrb.mxu3 %v8075_v43 }
 0x202   : > { %5360 = vmatpush.bf16.msrb.mxu0 %v8050_v46  ;;  %v5134_v6 = vpop.f32.mrf.mxu2 }
 0x203   : > { %5373 = vmatpush.bf16.msrb.mxu1 %v8058_v47  ;;  %v5147_v8 = vpop.f32.mrf.mxu3 }
 0x204   : > { %5386 = vmatpush.bf16.msrb.mxu2 %v8066_v49 }
 0x205   : > { %5399 = vmatpush.bf16.msrb.mxu3 %v8074_v50 }
 0x206   : > { %5361 = vmatpush.bf16.msrb.mxu0 %v8049_v52 }
 0x207   : > { %5374 = vmatpush.bf16.msrb.mxu1 %v8057_v53 }
 0x208   : > { %5387 = vmatpush.bf16.msrb.mxu2 %v8065_v54 }
 0x209   : > { %5400 = vmatpush.bf16.msrb.mxu3 %v8073_v55 }
 0x20a   : > { %5362 = vmatpush.bf16.msrb.mxu0 %v8048_v61 }
 0x20b   : > { %5375 = vmatpush.bf16.msrb.mxu1 %v8056_v62 }
 0x20c   : > { %5388 = vmatpush.bf16.msrb.mxu2 %v8064_v0 }
 0x20d   : > { %5401 = vmatpush.bf16.msrb.mxu3 %v8072_v1 }
 0x20e   : > { %5363 = vmatpush.bf16.msrb.mxu0 %v8047_v2 }
 0x20f   : > { %5376 = vmatpush.bf16.msrb.mxu1 %v8055_v3 }
 0x210   : > { %5389 = vmatpush.bf16.msrb.mxu2 %v8063_v4 }
 0x211   : > { %5402 = vmatpush.bf16.msrb.mxu3 %v8071_v5 }
 0x212   : > { %5364 = vmatpush.bf16.msrb.mxu0 %v8046_v7  ;;  %v5158_v20 = vpop.f32.mrf.mxu0 }
 0x213   : > { %5377 = vmatpush.bf16.msrb.mxu1 %v8054_v9  ;;  %v5159_v21 = vadd.f32 %v5158_v20, %v5146_v60  ;;  %v5171_v22 = vpop.f32.mrf.mxu1 }
 0x214   : > { %5390 = vmatpush.bf16.msrb.mxu2 %v8062_v10 }
 0x215   : > { %5403 = vmatpush.bf16.msrb.mxu3 %v8070_v11  ;;  %5365 = vmatmul.bf16.vlgmr.msrb.gmra.mxu0 %v477_v16  ;;  %v5172_v23 = vadd.f32 %v5171_v22, %v5159_v21 }
 0x216   : > { %5378 = vmatmul.bf16.vlgmr.msrb.gmra.mxu1 %v478_v17 }
 0x217   : > { %5391 = vmatmul.bf16.vlgmr.msrb.gmra.mxu2 %v479_v18 }
 0x218   : > { %5404 = vmatmul.bf16.vlgmr.msrb.gmra.mxu3 %v480_v19 }
 0x21a   : > { %v5184_v24 = vpop.f32.mrf.mxu2  ;;  %v5160_v27 = vpop.f32.mrf.mxu0 }
 0x21b   : > { %v5185_v25 = vadd.f32 %v5184_v24, %v5172_v23  ;;  %v5197_v26 = vpop.f32.mrf.mxu3  ;;  %v5173_v29 = vpop.f32.mrf.mxu1 }
 0x21d   : > { %v5198_v28 = vadd.f32 %v5197_v26, %v5185_v25 }
 0x222   : > { %v5186_v30 = vpop.f32.mrf.mxu2 }
 0x223   : > { %v5199_v31 = vpop.f32.mrf.mxu3 }
 0x232   : > { %v5210_v32 = vpop.f32.mrf.mxu0 }
 0x233   : > { %v5211_v33 = vadd.f32 %v5210_v32, %v5198_v28  ;;  %v5223_v34 = vpop.f32.mrf.mxu1 }
 0x235   : > { %v5224_v35 = vadd.f32 %v5223_v34, %v5211_v33 }
 0x23a   : > { %v5236_v36 = vpop.f32.mrf.mxu2  ;;  %v5212_v39 = vpop.f32.mrf.mxu0 }
 0x23b   : > { %v5237_v37 = vadd.f32 %v5236_v36, %v5224_v35  ;;  %v5249_v38 = vpop.f32.mrf.mxu3  ;;  %v5225_v41 = vpop.f32.mrf.mxu1 }
 0x23d   : > { %v5250_v40 = vadd.f32 %v5249_v38, %v5237_v37 }
 0x242   : > { %v5238_v42 = vpop.f32.mrf.mxu2 }
 0x243   : > { %v5251_v43 = vpop.f32.mrf.mxu3 }
 0x252   : > { %v5262_v44 = vpop.f32.mrf.mxu0 }
 0x253   : > { %v5275_v45 = vpop.f32.mrf.mxu1  ;;  %v5263_v55 = vadd.f32 %v5262_v44, %v5250_v40 }
 0x255   : > { %v5276_v59 = vadd.f32 %v5275_v45, %v5263_v55 }
 0x25a   : > { %v5288_v46 = vpop.f32.mrf.mxu2  ;;  %v5264_v48 = vpop.f32.mrf.mxu0 }
 0x25b   : > { %v5301_v47 = vpop.f32.mrf.mxu3  ;;  %v5277_v49 = vpop.f32.mrf.mxu1  ;;  %v5289_v60 = vadd.f32 %v5288_v46, %v5276_v59 }
 0x25d   : > { %v5302_v63 = vadd.f32 %v5301_v47, %v5289_v60 }
 0x262   : > { %v5290_v50 = vpop.f32.mrf.mxu2 }
 0x263   : > { %v5303_v51 = vpop.f32.mrf.mxu3 }
 0x272   : > { %v5314_v52 = vpop.f32.mrf.mxu0 }
 0x273   : > { %v5327_v53 = vpop.f32.mrf.mxu1  ;;  %v5315_v0 = vadd.f32 %v5314_v52, %v5302_v63 }
 0x275   : > { %v5328_v1 = vadd.f32 %v5327_v53, %v5315_v0 }
 0x27a   : > { %v5340_v54 = vpop.f32.mrf.mxu2  ;;  %v5316_v57 = vpop.f32.mrf.mxu0 }
 0x27b   : > { %v5353_v56 = vpop.f32.mrf.mxu3  ;;  %v5329_v58 = vpop.f32.mrf.mxu1  ;;  %v5341_v2 = vadd.f32 %v5340_v54, %v5328_v1 }
 0x27d   : > { %v5354_v3 = vadd.f32 %v5353_v56, %v5341_v2 }
 0x282   : > { %v5342_v61 = vpop.f32.mrf.mxu2 }
 0x283   : > { %v5355_v62 = vpop.f32.mrf.mxu3 }
 0x292   : > { %v5366_v4 = vpop.f32.mrf.mxu0 }
 0x293   : > { %v5379_v5 = vpop.f32.mrf.mxu1  ;;  %v5367_v6 = vadd.f32 %v5366_v4, %v5354_v3 }
 0x295   : > { %v5380_v7 = vadd.f32 %v5379_v5, %v5367_v6 }
 0x29a   : > { %v5392_v8 = vpop.f32.mrf.mxu2  ;;  %v5368_v11 = vpop.f32.mrf.mxu0 }
 0x29b   : > { %v5405_v9 = vpop.f32.mrf.mxu3  ;;  %v5393_v10 = vadd.f32 %v5392_v8, %v5380_v7  ;;  %v5381_v12 = vpop.f32.mrf.mxu1 }
 0x29d   : > { %v5406_v14 = vadd.f32 %v5405_v9, %v5393_v10 }
 0x29f   : > { %v5409_v15 = vadd.f32 %v5406_v14, %v239_v13  ;;  %5414 = sbr.rel (%p7563_p6) target bundleno = 837 (0x345), region = 48 }
 0x2a1   : > { %5410 = vst [vmem:[#allocation2] sm:$0x3] %v5409_v15 }
 0x2a2   : > { %v5394_v16 = vpop.f32.mrf.mxu2 }
 0x2a3   : > { %v5407_v17 = vpop.f32.mrf.mxu3 }
 0x2a4   : > { %v5439_v18 = vld [vmem:[%s8821_s3 + $0x78] sm:$0xff]  ;;  %v5438_v19 = vld [vmem:[%s8821_s3 + $0x70] sm:$0xff]  ;;  %v5437_v20 = vld [vmem:[%s8821_s3 + $0x68] sm:$0xff]  ;;  %vm5464_vm1 = vcmask 99328  }
 0x2a5   : > { %5444 = vmatpush.msra.mxu0 %v5439_v18  ;;  %v5436_v21 = vld [vmem:[%s8821_s3 + $0x60] sm:$0xff]  ;;  %v5435_v22 = vld [vmem:[%s8821_s3 + $0x58] sm:$0xff]  ;;  %v5434_v23 = vld [vmem:[%s8821_s3 + $0x50] sm:$0xff] }
 0x2a6   : > { %v5433_v24 = vld [vmem:[%s8821_s3 + $0x48] sm:$0xff]  ;;  %v5432_v25 = vld [vmem:[%s8821_s3 + $0x40] sm:$0xff]  ;;  %v5431_v26 = vld [vmem:[%s8821_s3 + $0x38] sm:$0xff] }
 0x2a7   : > { %5445 = vmatpush.msra.mxu0 %v5438_v19  ;;  %v5430_v27 = vld [vmem:[%s8821_s3 + $0x30] sm:$0xff]  ;;  %v8087_v28 = vld [vmem:[%s8820_s2] ss:$0 sm:$0xff]  ;;  %v5429_v29 = vld [vmem:[%s8821_s3 + $0x28] sm:$0xff] }
 0x2a8   : > { %v5415_v30 = vld [vmem:[#allocation2] sm:$0x3]  ;;  %v5428_v31 = vld [vmem:[%s8821_s3 + $0x20] sm:$0xff]  ;;  %v5427_v33 = vld [vmem:[%s8821_s3 + $0x18] sm:$0xff] }
 0x2a9   : > { %5446 = vmatpush.msra.mxu0 %v5437_v20  ;;  %v5420_v32 = vadd.f32 %v8087_v28, %v5415_v30  ;;  %v5426_v34 = vld [vmem:[%s8821_s3 + $0x10] sm:$0xff]  ;;  %v5425_v36 = vld [vmem:[%s8821_s3 + $0x8] sm:$0xff]  ;;  %v5424_v37 = vld [vmem:[%s8821_s3] sm:$0xff] }
 0x2aa   : > { %v8088_v39 = vld [vmem:[%s8822_s4] ss:$0 sm:$0xff] }
 0x2ab   : > { %5447 = vmatpush.msra.mxu0 %v5436_v21  ;;  %v5422_v35 = vmul.f32 0.1, %v5420_v32  ;;  %vm5421_vm0 = vcmp.ge.f32.partialorder %v5420_v32, 0.0 }
 0x2ad   : > { %5448 = vmatpush.msra.mxu0 %v5435_v22  ;;  %v5423_v38 = vsel %vm5421_vm0, %v5420_v32, %v5422_v35 }
 0x2af   : > { %5449 = vmatpush.msra.mxu0 %v5434_v23 }
 0x2b1   : > { %5450 = vmatpush.msra.mxu0 %v5433_v24 }
 0x2b3   : > { %5451 = vmatpush.msra.mxu0 %v5432_v25 }
 0x2b5   : > { %5452 = vmatpush.msra.mxu0 %v5431_v26 }
 0x2b7   : > { %5453 = vmatpush.msra.mxu0 %v5430_v27 }
 0x2b9   : > { %5454 = vmatpush.msra.mxu0 %v5429_v29 }
 0x2bb   : > { %5455 = vmatpush.msra.mxu0 %v5428_v31 }
 0x2bd   : > { %5456 = vmatpush.msra.mxu0 %v5427_v33 }
 0x2bf   : > { %5457 = vmatpush.msra.mxu0 %v5426_v34 }
 0x2c1   : > { %5458 = vmatpush.msra.mxu0 %v5425_v36 }
 0x2c3   : > { %5459 = vmatpush.msra.mxu0 %v5424_v37 }
 0x2c4   : > { %5460 = vmatmul.f32.vlgmr.msra.gmra.mxu0 %v5423_v38 }
 0x341   : > { %v5461_v40 = vpop.f32.mrf.mxu0 }
 0x342   : > { %v5462_v41 = vadd.f32 %v8088_v39, %v5461_v40 }
 0x344   : > { %5465 = vst.msk [vmem:[%s8823_s5] sm:$0x3] %vm5464_vm1, %v5462_v41 }
 0x345 PF: > { %s15_s18 = sadd.s32 1, %s8095_s18  }
 0x346   : > { %p12_p7 = scmp.ge.s32.totalorder %s15_s18, 4  }
 0x348   :  { %14 = sbr.rel (!%p12_p7) target bundleno = 1 (0x1), region = 78 }

</bundles_post_ra>
